<compile_context>
chip_gen: v7x
topology: tpu7x:2x2x1
jax: 0.10.0
libtpu: 0.0.40
codegen_flags: <defaults>
</compile_context>

<pallas_src>
import functools

import jax
import jax.numpy as jnp
from jax.experimental import pallas as pl
from jax.experimental.pallas import tpu as pltpu  # noqa: F401  (TPU backend)


# ----------------------------------------------------------------------------
# Single fused kernel: block-diagonal batched TAGConv stack + mean readout
# (as a matmul) + embed + L2 normalize.  Runs once (no grid).
# ----------------------------------------------------------------------------
def _fused_classifier_kernel(a_ref, x_ref, m_ref, *rest, n_layers, hops):
    # rest = (w0_hop0, ..., w0_hopH, b0, w1_hop0, ..., w1_hopH, b1,
    #         embed_w, embed_b, out_ref)
    o_ref = rest[-1]
    eb_ref = rest[-2]
    ew_ref = rest[-3]
    layer_refs = rest[:-3]
    per_layer = hops + 2  # hops+1 weight slices + 1 bias

    a = a_ref[...]                                  # (B*N, B*N) block-diag adjacency
    h = x_ref[...]                                  # (B*N, in_dim) stacked features

    for li in range(n_layers):
        refs = layer_refs[li * per_layer:(li + 1) * per_layer]
        w_refs = refs[:hops + 1]
        b_ref = refs[hops + 1]
        # z = sum_k (A^k h) @ W_k   (no lane-axis concat)
        f = h
        z = jnp.dot(f, w_refs[0][...], preferred_element_type=jnp.float32)
        for k in range(1, hops + 1):
            f = jnp.dot(a, f, preferred_element_type=jnp.float32)
            z = z + jnp.dot(f, w_refs[k][...], preferred_element_type=jnp.float32)
        # dropout between layers is identity at inference time
        h = jnp.maximum(z + b_ref[...], 0.0)        # ReLU (TAGConv activation)

    # mean readout over each graph's nodes as a matmul:  (B, B*N) @ (B*N, hidden)
    hg = jnp.dot(m_ref[...], h, preferred_element_type=jnp.float32)   # (B, hidden)
    # embed linear
    e = jnp.dot(hg, ew_ref[...], preferred_element_type=jnp.float32) + eb_ref[...]
    # F.normalize(p=2, dim=1, eps=1e-12)  ==  e * rsqrt(max(sum(e^2), eps^2))
    sumsq = jnp.sum(e * e, axis=1, keepdims=True)
    inv = jax.lax.rsqrt(jnp.maximum(sumsq, 1e-24))
    o_ref[...] = e * inv                            # (B, embed_dim), one dense store


def classifier_forward(a_hat, x, params, *, hops):
    """Batched forward: a_hat (B,N,N), x (B,N,in_dim) -> (B, embed_dim)."""
    b, n, _ = a_hat.shape
    in_dim = x.shape[-1]
    layers = params["tag_layers"]
    ew, eb = params["embed_w"], params["embed_b"]
    embed_dim = ew.shape[1]
    n_layers = len(layers)
    bn = b * n

    # Host-side restructuring (cheap, one-time per call):
    # block-diagonal adjacency (B*N, B*N)
    eye_b = jnp.eye(b, dtype=a_hat.dtype)
    a_blk = jnp.einsum("bij,bc->bicj", a_hat, eye_b).reshape(bn, bn)
    # stacked node features (B*N, in_dim)
    x_flat = x.reshape(bn, in_dim)
    # mean-readout pooling matrix (B, B*N): 1/N inside each graph's block
    m_pool = jnp.repeat(jnp.eye(b, dtype=jnp.float32), n, axis=1) / float(n)

    # split each TAGConv weight (d_in*(hops+1), d_out) into per-hop slices so the
    # kernel never concatenates along the lane axis.
    flat_weights = []
    for (w, bb) in layers:
        d_in = w.shape[0] // (hops + 1)
        for k in range(hops + 1):
            flat_weights.append(w[k * d_in:(k + 1) * d_in, :])
        flat_weights.append(bb)
    flat_weights += [ew, eb]

    # One kernel invocation, no grid: all operands are small and fully
    # VMEM-resident; output is a single dense (B, embed_dim) block.
    out = pl.pallas_call(
        functools.partial(_fused_classifier_kernel, n_layers=n_layers, hops=hops),
        out_shape=jax.ShapeDtypeStruct((b, embed_dim), jnp.float32),
    )(a_blk, x_flat, m_pool, *flat_weights)
    return out


# ----------------------------------------------------------------------------
# Pure-JAX reference (same math, per-graph) for a correctness check.
# ----------------------------------------------------------------------------
def classifier_ref(a_hat, x, params, *, hops):
    def one_graph(a, h):
        for (w, bb) in params["tag_layers"]:
            feats = [h]
            f = h
            for _ in range(hops):
                f = a @ f
                feats.append(f)
            h = jnp.maximum(jnp.concatenate(feats, axis=1) @ w + bb, 0.0)
        hg = jnp.mean(h, axis=0, keepdims=True)
        e = hg @ params["embed_w"] + params["embed_b"]
        nrm = jnp.sqrt(jnp.sum(e * e, axis=1, keepdims=True))
        return (e / jnp.maximum(nrm, 1e-12))[0]
    return jax.vmap(one_graph)(a_hat, x)


# ----------------------------------------------------------------------------
# Parameter / graph construction (deterministic, synthetic)
# ----------------------------------------------------------------------------
def init_params(key, in_dim, hidden_dim, embed_dim, hidden_layers, hops):
    keys = jax.random.split(key, 2 * (hidden_layers + 1) + 2)
    layers = []
    dims = [in_dim] + [hidden_dim] * (hidden_layers + 1)
    ki = 0
    for li in range(hidden_layers + 1):
        d_in, d_out = dims[li], dims[li + 1]
        fan_in = d_in * (hops + 1)
        w = jax.random.normal(keys[ki], (fan_in, d_out), jnp.float32) * (1.0 / jnp.sqrt(fan_in))
        b = jax.random.normal(keys[ki + 1], (1, d_out), jnp.float32) * 0.01
        layers.append((w, b))
        ki += 2
    embed_w = jax.random.normal(keys[ki], (hidden_dim, embed_dim), jnp.float32) * (1.0 / jnp.sqrt(hidden_dim))
    embed_b = jax.random.normal(keys[ki + 1], (1, embed_dim), jnp.float32) * 0.01
    return {"tag_layers": layers, "embed_w": embed_w, "embed_b": embed_b}


def random_norm_adj(key, b, n, p=0.3):
    """Batch of random symmetric graphs, D^{-1/2} A D^{-1/2} normalized."""
    u = jax.random.uniform(key, (b, n, n))
    a = (u < p).astype(jnp.float32)
    a = jnp.maximum(a, jnp.swapaxes(a, 1, 2))            # symmetrize
    a = a * (1.0 - jnp.eye(n, dtype=jnp.float32))        # no self-loops
    deg = jnp.sum(a, axis=2)
    d_inv_sqrt = 1.0 / jnp.sqrt(jnp.maximum(deg, 1.0))
    return a * d_inv_sqrt[:, :, None] * d_inv_sqrt[:, None, :]


if __name__ == "__main__":
    B = 16             # batch of graphs; B*N = 256 rows fills the 2x256 MXU
    N = 16             # nodes per graph (no padded/dummy nodes -> exact mean)
    IN_DIM = 8
    HIDDEN_DIM = 32
    EMBED_DIM = 16
    HIDDEN_LAYERS = 1  # => 2 TAGConv layers total
    HOPS = 2

    key = jax.random.PRNGKey(0)
    k_feat, k_adj, k_params = jax.random.split(key, 3)

    x = jax.random.normal(k_feat, (B, N, IN_DIM), jnp.float32)   # g.ndata['h'] per graph
    a_hat = random_norm_adj(k_adj, B, N)                         # dense normalized adjacency
    params = init_params(k_params, IN_DIM, HIDDEN_DIM, EMBED_DIM, HIDDEN_LAYERS, HOPS)

    out = classifier_forward(a_hat, x, params, hops=HOPS)
    out = jax.block_until_ready(out)

    assert out.shape == (B, EMBED_DIM)

    # correctness vs. pure-JAX reference (tight tol: f32 MXU path)
    ref = classifier_ref(a_hat, x, params, hops=HOPS)
    assert jnp.allclose(out, ref, atol=1e-4, rtol=1e-4), "mismatch vs reference"

    # outputs must be L2-normalized per graph
    norms = jnp.sum(out * out, axis=1)
    assert jnp.allclose(norms, jnp.ones_like(norms), atol=1e-4)

    print("KERNEL_OK")
</pallas_src>

<mosaic_0001>
module attributes {stable_mosaic.version = 11 : i64} {
  func.func @_fused_classifier_kernel(%arg0: memref<256x256xf32, #tpu.memory_space<vmem>>, %arg1: memref<256x8xf32, #tpu.memory_space<vmem>>, %arg2: memref<16x256xf32, #tpu.memory_space<vmem>>, %arg3: memref<8x32xf32, #tpu.memory_space<vmem>>, %arg4: memref<8x32xf32, #tpu.memory_space<vmem>>, %arg5: memref<8x32xf32, #tpu.memory_space<vmem>>, %arg6: memref<1x32xf32, #tpu.memory_space<vmem>>, %arg7: memref<32x32xf32, #tpu.memory_space<vmem>>, %arg8: memref<32x32xf32, #tpu.memory_space<vmem>>, %arg9: memref<32x32xf32, #tpu.memory_space<vmem>>, %arg10: memref<1x32xf32, #tpu.memory_space<vmem>>, %arg11: memref<32x16xf32, #tpu.memory_space<vmem>>, %arg12: memref<1x16xf32, #tpu.memory_space<vmem>>, %arg13: memref<16x16xf32, #tpu.memory_space<vmem>>) attributes {dimension_semantics = [], scalar_prefetch = 0 : i64, scratch_operands = 0 : i64, tpu.core_type = #tpu.core_type<tc>} {
    %c0 = arith.constant 0 : index
    %c0_0 = arith.constant 0 : index
    %0 = vector.load %arg0[%c0, %c0_0] : memref<256x256xf32, #tpu.memory_space<vmem>>, vector<256x256xf32>
    %c0_1 = arith.constant 0 : index
    %c0_2 = arith.constant 0 : index
    %1 = vector.load %arg1[%c0_1, %c0_2] : memref<256x8xf32, #tpu.memory_space<vmem>>, vector<256x8xf32>
    %c0_3 = arith.constant 0 : index
    %c0_4 = arith.constant 0 : index
    %2 = vector.load %arg3[%c0_3, %c0_4] : memref<8x32xf32, #tpu.memory_space<vmem>>, vector<8x32xf32>
    %cst = arith.constant dense<0.000000e+00> : vector<256x32xf32>
    %3 = tpu.matmul %1, %2, %cst {dimension_numbers = #tpu.dot_dimension_numbers<[1], [0], [0], [1], [0, 0, 1, 1], [], []>} : vector<256x8xf32>, vector<8x32xf32>, vector<256x32xf32> -> vector<256x32xf32>
    %cst_5 = arith.constant dense<0.000000e+00> : vector<256x8xf32>
    %4 = tpu.matmul %0, %1, %cst_5 {dimension_numbers = #tpu.dot_dimension_numbers<[1], [0], [0], [1], [0, 0, 1, 1], [], []>} : vector<256x256xf32>, vector<256x8xf32>, vector<256x8xf32> -> vector<256x8xf32>
    %c0_6 = arith.constant 0 : index
    %c0_7 = arith.constant 0 : index
    %5 = vector.load %arg4[%c0_6, %c0_7] : memref<8x32xf32, #tpu.memory_space<vmem>>, vector<8x32xf32>
    %cst_8 = arith.constant dense<0.000000e+00> : vector<256x32xf32>
    %6 = tpu.matmul %4, %5, %cst_8 {dimension_numbers = #tpu.dot_dimension_numbers<[1], [0], [0], [1], [0, 0, 1, 1], [], []>} : vector<256x8xf32>, vector<8x32xf32>, vector<256x32xf32> -> vector<256x32xf32>
    %7 = arith.addf %3, %6 : vector<256x32xf32>
    %cst_9 = arith.constant dense<0.000000e+00> : vector<256x8xf32>
    %8 = tpu.matmul %0, %4, %cst_9 {dimension_numbers = #tpu.dot_dimension_numbers<[1], [0], [0], [1], [0, 0, 1, 1], [], []>} : vector<256x256xf32>, vector<256x8xf32>, vector<256x8xf32> -> vector<256x8xf32>
    %c0_10 = arith.constant 0 : index
    %c0_11 = arith.constant 0 : index
    %9 = vector.load %arg5[%c0_10, %c0_11] : memref<8x32xf32, #tpu.memory_space<vmem>>, vector<8x32xf32>
    %cst_12 = arith.constant dense<0.000000e+00> : vector<256x32xf32>
    %10 = tpu.matmul %8, %9, %cst_12 {dimension_numbers = #tpu.dot_dimension_numbers<[1], [0], [0], [1], [0, 0, 1, 1], [], []>} : vector<256x8xf32>, vector<8x32xf32>, vector<256x32xf32> -> vector<256x32xf32>
    %11 = arith.addf %7, %10 : vector<256x32xf32>
    %c0_13 = arith.constant 0 : index
    %c0_14 = arith.constant 0 : index
    %12 = vector.load %arg6[%c0_13, %c0_14] : memref<1x32xf32, #tpu.memory_space<vmem>>, vector<1x32xf32>
    %13 = vector.broadcast %12 : vector<1x32xf32> to vector<256x32xf32>
    %14 = arith.addf %11, %13 : vector<256x32xf32>
    %cst_15 = arith.constant 0.000000e+00 : f32
    %15 = vector.broadcast %cst_15 : f32 to vector<256x32xf32>
    %16 = arith.maximumf %14, %15 : vector<256x32xf32>
    %c0_16 = arith.constant 0 : index
    %c0_17 = arith.constant 0 : index
    %17 = vector.load %arg7[%c0_16, %c0_17] : memref<32x32xf32, #tpu.memory_space<vmem>>, vector<32x32xf32>
    %cst_18 = arith.constant dense<0.000000e+00> : vector<256x32xf32>
    %18 = tpu.matmul %16, %17, %cst_18 {dimension_numbers = #tpu.dot_dimension_numbers<[1], [0], [0], [1], [0, 0, 1, 1], [], []>} : vector<256x32xf32>, vector<32x32xf32>, vector<256x32xf32> -> vector<256x32xf32>
    %cst_19 = arith.constant dense<0.000000e+00> : vector<256x32xf32>
    %19 = tpu.matmul %0, %16, %cst_19 {dimension_numbers = #tpu.dot_dimension_numbers<[1], [0], [0], [1], [0, 0, 1, 1], [], []>} : vector<256x256xf32>, vector<256x32xf32>, vector<256x32xf32> -> vector<256x32xf32>
    %c0_20 = arith.constant 0 : index
    %c0_21 = arith.constant 0 : index
    %20 = vector.load %arg8[%c0_20, %c0_21] : memref<32x32xf32, #tpu.memory_space<vmem>>, vector<32x32xf32>
    %cst_22 = arith.constant dense<0.000000e+00> : vector<256x32xf32>
    %21 = tpu.matmul %19, %20, %cst_22 {dimension_numbers = #tpu.dot_dimension_numbers<[1], [0], [0], [1], [0, 0, 1, 1], [], []>} : vector<256x32xf32>, vector<32x32xf32>, vector<256x32xf32> -> vector<256x32xf32>
    %22 = arith.addf %18, %21 : vector<256x32xf32>
    %cst_23 = arith.constant dense<0.000000e+00> : vector<256x32xf32>
    %23 = tpu.matmul %0, %19, %cst_23 {dimension_numbers = #tpu.dot_dimension_numbers<[1], [0], [0], [1], [0, 0, 1, 1], [], []>} : vector<256x256xf32>, vector<256x32xf32>, vector<256x32xf32> -> vector<256x32xf32>
    %c0_24 = arith.constant 0 : index
    %c0_25 = arith.constant 0 : index
    %24 = vector.load %arg9[%c0_24, %c0_25] : memref<32x32xf32, #tpu.memory_space<vmem>>, vector<32x32xf32>
    %cst_26 = arith.constant dense<0.000000e+00> : vector<256x32xf32>
    %25 = tpu.matmul %23, %24, %cst_26 {dimension_numbers = #tpu.dot_dimension_numbers<[1], [0], [0], [1], [0, 0, 1, 1], [], []>} : vector<256x32xf32>, vector<32x32xf32>, vector<256x32xf32> -> vector<256x32xf32>
    %26 = arith.addf %22, %25 : vector<256x32xf32>
    %c0_27 = arith.constant 0 : index
    %c0_28 = arith.constant 0 : index
    %27 = vector.load %arg10[%c0_27, %c0_28] : memref<1x32xf32, #tpu.memory_space<vmem>>, vector<1x32xf32>
    %28 = vector.broadcast %27 : vector<1x32xf32> to vector<256x32xf32>
    %29 = arith.addf %26, %28 : vector<256x32xf32>
    %cst_29 = arith.constant 0.000000e+00 : f32
    %30 = vector.broadcast %cst_29 : f32 to vector<256x32xf32>
    %31 = arith.maximumf %29, %30 : vector<256x32xf32>
    %c0_30 = arith.constant 0 : index
    %c0_31 = arith.constant 0 : index
    %32 = vector.load %arg2[%c0_30, %c0_31] : memref<16x256xf32, #tpu.memory_space<vmem>>, vector<16x256xf32>
    %cst_32 = arith.constant dense<0.000000e+00> : vector<16x32xf32>
    %33 = tpu.matmul %32, %31, %cst_32 {dimension_numbers = #tpu.dot_dimension_numbers<[1], [0], [0], [1], [0, 0, 1, 1], [], []>} : vector<16x256xf32>, vector<256x32xf32>, vector<16x32xf32> -> vector<16x32xf32>
    %c0_33 = arith.constant 0 : index
    %c0_34 = arith.constant 0 : index
    %34 = vector.load %arg11[%c0_33, %c0_34] : memref<32x16xf32, #tpu.memory_space<vmem>>, vector<32x16xf32>
    %cst_35 = arith.constant dense<0.000000e+00> : vector<16x16xf32>
    %35 = tpu.matmul %33, %34, %cst_35 {dimension_numbers = #tpu.dot_dimension_numbers<[1], [0], [0], [1], [0, 0, 1, 1], [], []>} : vector<16x32xf32>, vector<32x16xf32>, vector<16x16xf32> -> vector<16x16xf32>
    %c0_36 = arith.constant 0 : index
    %c0_37 = arith.constant 0 : index
    %36 = vector.load %arg12[%c0_36, %c0_37] : memref<1x16xf32, #tpu.memory_space<vmem>>, vector<1x16xf32>
    %37 = vector.broadcast %36 : vector<1x16xf32> to vector<16x16xf32>
    %38 = arith.addf %35, %37 : vector<16x16xf32>
    %39 = arith.mulf %38, %38 : vector<16x16xf32>
    %cst_38 = arith.constant dense<0.000000e+00> : vector<16xf32>
    %40 = vector.multi_reduction <add>, %39, %cst_38 [1] : vector<16x16xf32> to vector<16xf32>
    %41 = vector.shape_cast %40 : vector<16xf32> to vector<16x1xf32>
    %cst_39 = arith.constant 1.000000e-24 : f32
    %42 = vector.broadcast %cst_39 : f32 to vector<16x1xf32>
    %43 = arith.maximumf %41, %42 : vector<16x1xf32>
    %44 = math.rsqrt %43 : vector<16x1xf32>
    %45 = vector.broadcast %44 : vector<16x1xf32> to vector<16x16xf32>
    %46 = arith.mulf %38, %45 : vector<16x16xf32>
    %c0_40 = arith.constant 0 : index
    %c0_41 = arith.constant 0 : index
    %47 = vector.load %arg13[%c0_40, %c0_41] : memref<16x16xf32, #tpu.memory_space<vmem>>, vector<16x16xf32>
    tpu.vector_store %arg13[%c0_40, %c0_41], %46 {strides = array<i32>} : memref<16x16xf32, #tpu.memory_space<vmem>>, vector<16x16xf32>,
    return
  }
}

</mosaic_0001>

<bundles_post_ra>
// kernel: tpu_custom_call.1
= control target key start
LH: loop header
LB: loop body
LE: loop exit
PB: predicated region body
PF: predicated region fallthrough
CT: control target
= control target key end

     0   :  { %18 = vsyncpa [#allocation3], 0  ;;  %s6353_s0 = inlined_call_operand.hbm [shape: f32[256,256], index: 0, kind: input, shape index: {}]   ;;  %s6354_s1 = inlined_call_operand.vmem [shape: f32[256,8], index: 1, kind: input, shape index: {}]   ;;  %s6355_s2 = inlined_call_operand.vmem [shape: f32[16,256], index: 2, kind: input, shape index: {}]   ;;  %s6356_s3 = inlined_call_operand.vmem [shape: f32[8,32], index: 3, kind: input, shape index: {}]   ;;  %s6357_s4 = inlined_call_operand.vmem [shape: f32[8,32], index: 4, kind: input, shape index: {}]   ;;  %s6358_s5 = inlined_call_operand.vmem [shape: f32[8,32], index: 5, kind: input, shape index: {}]   ;;  %s6359_s6 = inlined_call_operand.vmem [shape: f32[1,32], index: 6, kind: input, shape index: {}]   ;;  %s6360_s7 = inlined_call_operand.vmem [shape: f32[32,32], index: 7, kind: input, shape index: {}]   ;;  %s6361_s8 = inlined_call_operand.vmem [shape: f32[32,32], index: 8, kind: input, shape index: {}]   ;;  %s6362_s9 = inlined_call_operand.vmem [shape: f32[32,32], index: 9, kind: input, shape index: {}]   ;;  %s6363_s10 = inlined_call_operand.vmem [shape: f32[1,32], index: 10, kind: input, shape index: {}]   ;;  %s6364_s11 = inlined_call_operand.vmem [shape: f32[32,16], index: 11, kind: input, shape index: {}]   ;;  %s6365_s12 = inlined_call_operand.vmem [shape: f32[1,16], index: 12, kind: input, shape index: {}]   ;;  %s6366_s13 = inlined_call_operand.hbm [shape: f32[16,16], index: 13, kind: output, shape index: {}]  }
   0x1   :  { %19 = vsyncpa [#allocation4], 0  ;;  %s4693_s25 = smov [#allocation2]   ;;  %s4645_s29 = scalar_lea.hbm %s6353_s0, 8192 }
   0x2   :  { %s25_s26 = sshll.u32 %s4693_s25, 4  ;;  %p4646_p0 = scmp.ne.s32.totalorder %s6353_s0, %s4645_s29  ;;  %s26_s26 = int_to_ptr.vmem [resolvable:$true] %s25_s26 }
   0x3   :  { %p4649_p1 = scmp.lt.u32.totalorder %s4645_s29, %s6353_s0 }
   0x5   :  { %p4651_p2 = pnand %p4649_p1, %p4646_p0 }
   0x7   :  { %4654 = shalt.err (!%p4651_p2)
}
   0x8   :  { %s4655_s17 = scalar_lea.vmem %s26_s26, 8192  ;;  %p4660_p4 = scmp.lt.s32.totalorder %s26_s26, %s26_s26 }
   0x9   :  { %p4656_p3 = scmp.ne.s32.totalorder %s26_s26, %s4655_s17  ;;  %p4661_p5 = scmp.lt.s32.totalorder %s4655_s17, %s4655_s17 }
   0xb   :  { %p4662_p6 = por %p4661_p5, %p4660_p4 }
   0xd   :  { %p4663_p7 = pnand %p4662_p6, %p4656_p3 }
   0xf   :  { %4666 = shalt.err (!%p4663_p7)
}
  0x10   :  { %s4694_s18 = smov 256   ;;  %s4695_s19 = smov 16  }
  0x11   :  { %31 = dma.hbm_to_vmem [thread:$0]  %s6353_s0, 8192, %s26_s26, [#allocation3], %s4694_s18, %s4694_s18, %s4695_s19  }
  0x12   :  { %4689 = dma.done.wait [#allocation3], 8192  }
  0x13   :  { %4690 = vsyncadd [#allocation3], 4294959104  ;;  %v6367_v0 = vmov 0.0|0.0   ;;  %v4786_v1 = vld [vmem:[%s6354_s1] sm:$0xff]  ;;  %v4791_v2 = vld [vmem:[%s6354_s1 + $0x8] sm:$0xff]  ;;  %vm382_vm0 = vcmask 64512  }
  0x14   :  { %4186 = vmatprep.subr.bf16.mxu0 %v6367_v0  ;;  %v4796_v3 = vld [vmem:[%s6354_s1 + $0x10] sm:$0xff]  ;;  %v4187_v4 = vpack.c.bf16 %v4791_v2, %v4786_v1  ;;  %v4803_v5 = vld [vmem:[%s6354_s1 + $0x18] sm:$0xff]  ;;  %v4811_v7 = vld [vmem:[%s6354_s1 + $0x20] sm:$0xff]  ;;  %vm1908_vm1 = vcmask 261120   ;;  %vm3377_vm2 = vcmask 130048  }
  0x15   :  { %v4190_v6 = vpack.c.bf16 %v4803_v5, %v4796_v3  ;;  %v4816_v8 = vld [vmem:[%s6354_s1 + $0x28] sm:$0xff]  ;;  %v4824_v10 = vld [vmem:[%s6354_s1 + $0x30] sm:$0xff]  ;;  %v4829_v11 = vld [vmem:[%s6354_s1 + $0x38] sm:$0xff] }
  0x16   :  { %4188 = vmatpush1.bf16.msra.mxu0 %v4187_v4  ;;  %v4193_v9 = vpack.c.bf16 %v4816_v8, %v4811_v7  ;;  %v4831_v12 = vld [vmem:[#allocation2 + $0x8] sm:$0xff]  ;;  %v4196_v13 = vpack.c.bf16 %v4829_v11, %v4824_v10  ;;  %v4840_v14 = vld [vmem:[%s6354_s1 + $0x40] sm:$0xff]  ;;  %v4853_v17 = vld [vmem:[%s6354_s1 + $0x50] sm:$0xff] }
  0x17   :  { %4189 = vmatprep.subr.bf16.mxu0 %v6367_v0  ;;  %6516 = vst [vmem:[#allocation8_spill] sm:$0xff] %v4831_v12  ;;  %220 = vmatprep.mubr.f32.mxu0 %v4831_v12  ;;  %v4845_v15 = vld [vmem:[%s6354_s1 + $0x48] sm:$0xff]  ;;  %v4858_v18 = vld [vmem:[%s6354_s1 + $0x58] sm:$0xff]  ;;  %v4866_v20 = vld [vmem:[%s6354_s1 + $0x60] sm:$0xff] }
  0x18   :  { %v4199_v16 = vpack.c.bf16 %v4845_v15, %v4840_v14  ;;  %v4202_v19 = vpack.c.bf16 %v4858_v18, %v4853_v17  ;;  %v4871_v21 = vld [vmem:[%s6354_s1 + $0x68] sm:$0xff]  ;;  %v4879_v23 = vld [vmem:[%s6354_s1 + $0x70] sm:$0xff]  ;;  %v4884_v24 = vld [vmem:[%s6354_s1 + $0x78] sm:$0xff] }
  0x19   :  { %v4205_v22 = vpack.c.bf16 %v4871_v21, %v4866_v20  ;;  %v4208_v25 = vpack.c.bf16 %v4884_v24, %v4879_v23  ;;  %v4892_v26 = vld [vmem:[%s6354_s1 + $0x80] sm:$0xff]  ;;  %v4897_v27 = vld [vmem:[%s6354_s1 + $0x88] sm:$0xff]  ;;  %v4905_v29 = vld [vmem:[%s6354_s1 + $0x90] sm:$0xff] }
  0x1a   :  { %4191 = vmatpush1.bf16.msra.mxu0 %v4190_v6  ;;  %v4211_v28 = vpack.c.bf16 %v4897_v27, %v4892_v26  ;;  %v4910_v30 = vld [vmem:[%s6354_s1 + $0x98] sm:$0xff]  ;;  %v4918_v32 = vld [vmem:[%s6354_s1 + $0xa0] sm:$0xff]  ;;  %v4923_v33 = vld [vmem:[%s6354_s1 + $0xa8] sm:$0xff] }
  0x1b   :  { %4192 = vmatprep.subr.bf16.mxu0 %v6367_v0  ;;  %v4214_v31 = vpack.c.bf16 %v4910_v30, %v4905_v29  ;;  %v4217_v34 = vpack.c.bf16 %v4923_v33, %v4918_v32  ;;  %v4931_v35 = vld [vmem:[%s6354_s1 + $0xb0] sm:$0xff]  ;;  %v4936_v36 = vld [vmem:[%s6354_s1 + $0xb8] sm:$0xff]  ;;  %v4944_v38 = vld [vmem:[%s6354_s1 + $0xc0] sm:$0xff] }
  0x1c   :  { %v4220_v37 = vpack.c.bf16 %v4936_v36, %v4931_v35  ;;  %v4949_v39 = vld [vmem:[%s6354_s1 + $0xc8] sm:$0xff]  ;;  %v4957_v41 = vld [vmem:[%s6354_s1 + $0xd0] sm:$0xff]  ;;  %v4962_v42 = vld [vmem:[%s6354_s1 + $0xd8] sm:$0xff] }
  0x1d   :  { %v4223_v40 = vpack.c.bf16 %v4949_v39, %v4944_v38  ;;  %v4226_v43 = vpack.c.bf16 %v4962_v42, %v4957_v41  ;;  %v4970_v44 = vld [vmem:[%s6354_s1 + $0xe0] sm:$0xff]  ;;  %v4975_v45 = vld [vmem:[%s6354_s1 + $0xe8] sm:$0xff]  ;;  %v4983_v47 = vld [vmem:[%s6354_s1 + $0xf0] sm:$0xff] }
  0x1e   :  { %4194 = vmatpush1.bf16.msra.mxu0 %v4193_v9  ;;  %6517 = vst [vmem:[#allocation9_spill] sm:$0xff] %v4970_v44  ;;  %6518 = vst [vmem:[#allocation10_spill] sm:$0xff] %v4975_v45  ;;  %v4229_v46 = vpack.c.bf16 %v4975_v45, %v4970_v44  ;;  %v4988_v48 = vld [vmem:[%s6354_s1 + $0xf8] sm:$0xff]  ;;  %v4993_v50 = vld [vmem:[#allocation2] sm:$0xff] }
  0x1f   :  { %4195 = vmatprep.subr.bf16.mxu0 %v6367_v0  ;;  %6519 = vst [vmem:[#allocation11_spill] sm:$0xff] %v4983_v47  ;;  %6520 = vst [vmem:[#allocation12_spill] sm:$0xff] %v4988_v48  ;;  %v4232_v49 = vpack.c.bf16 %v4988_v48, %v4983_v47  ;;  %v4995_v51 = vld [vmem:[#allocation2 + $0x18] sm:$0xff]  ;;  %v5000_v52 = vld [vmem:[#allocation2 + $0x10] sm:$0xff] }
  0x20   :  { %6521 = vst [vmem:[#allocation13_spill] sm:$0xff] %v4993_v50  ;;  %6522 = vst [vmem:[#allocation14_spill] sm:$0xff] %v4995_v51  ;;  %v5002_v53 = vld [vmem:[#allocation2 + $0x28] sm:$0xff]  ;;  %v5006_v54 = vld [vmem:[#allocation2 + $0x20] sm:$0xff] }
  0x21   :  { %6523 = vst [vmem:[#allocation15_spill] sm:$0xff] %v5000_v52  ;;  %6524 = vst [vmem:[#allocation16_spill] sm:$0xff] %v5002_v53  ;;  %v5008_v55 = vld [vmem:[#allocation2 + $0x38] sm:$0xff]  ;;  %v5012_v56 = vld [vmem:[#allocation2 + $0x30] sm:$0xff] }
  0x22   :  { %4197 = vmatpush1.bf16.msra.mxu0 %v4196_v13  ;;  %6525 = vst [vmem:[#allocation17_spill] sm:$0xff] %v5006_v54  ;;  %6526 = vst [vmem:[#allocation18_spill] sm:$0xff] %v5008_v55  ;;  %v5014_v57 = vld [vmem:[#allocation2 + $0x48] sm:$0xff]  ;;  %v5018_v58 = vld [vmem:[#allocation2 + $0x40] sm:$0xff] }
  0x23   :  { %4198 = vmatprep.subr.bf16.mxu0 %v6367_v0  ;;  %6527 = vst [vmem:[#allocation19_spill] sm:$0xff] %v5012_v56  ;;  %6528 = vst [vmem:[#allocation20_spill] sm:$0xff] %v5014_v57  ;;  %v5020_v59 = vld [vmem:[#allocation2 + $0x58] sm:$0xff]  ;;  %v5024_v60 = vld [vmem:[#allocation2 + $0x50] sm:$0xff] }
  0x24   :  { %6529 = vst [vmem:[#allocation21_spill] sm:$0xff] %v5018_v58  ;;  %6530 = vst [vmem:[#allocation22_spill] sm:$0xff] %v5020_v59  ;;  %v5026_v61 = vld [vmem:[#allocation2 + $0x68] sm:$0xff]  ;;  %v5030_v62 = vld [vmem:[#allocation2 + $0x60] sm:$0xff] }
  0x25   :  { %6531 = vst [vmem:[#allocation23_spill] sm:$0xff] %v5024_v60  ;;  %6532 = vst [vmem:[#allocation24_spill] sm:$0xff] %v5026_v61  ;;  %v5032_v63 = vld [vmem:[#allocation2 + $0x78] sm:$0xff]  ;;  %v5036_v4 = vld [vmem:[#allocation2 + $0x70] sm:$0xff] }
  0x26   :  { %4200 = vmatpush1.bf16.msra.mxu0 %v4199_v16  ;;  %6533 = vst [vmem:[#allocation25_spill] sm:$0xff] %v5030_v62  ;;  %6534 = vst [vmem:[#allocation26_spill] sm:$0xff] %v5032_v63  ;;  %v5038_v6 = vld [vmem:[#allocation2 + $0x88] sm:$0xff]  ;;  %v5042_v9 = vld [vmem:[#allocation2 + $0x80] sm:$0xff] }
  0x27   :  { %4201 = vmatprep.subr.bf16.mxu0 %v6367_v0  ;;  %6535 = vst [vmem:[#allocation27_spill] sm:$0xff] %v5036_v4  ;;  %6536 = vst [vmem:[#allocation28_spill] sm:$0xff] %v5038_v6  ;;  %v5044_v13 = vld [vmem:[#allocation2 + $0x98] sm:$0xff]  ;;  %v5048_v16 = vld [vmem:[#allocation2 + $0x90] sm:$0xff] }
  0x28   :  { %6537 = vst [vmem:[#allocation29_spill] sm:$0xff] %v5042_v9  ;;  %6538 = vst [vmem:[#allocation30_spill] sm:$0xff] %v5044_v13 }
  0x29   :  { %6539 = vst [vmem:[#allocation31_spill] sm:$0xff] %v5048_v16 }
  0x2a   :  { %4203 = vmatpush1.bf16.msra.mxu0 %v4202_v19  ;;  %v5050_v19 = vld [vmem:[#allocation2 + $0xa8] sm:$0xff] }
  0x2b   :  { %4204 = vmatprep.subr.bf16.mxu0 %v6367_v0  ;;  %6540 = vst [vmem:[#allocation32_spill] sm:$0xff] %v5050_v19 }
  0x2e   :  { %4206 = vmatpush1.bf16.msra.mxu0 %v4205_v22  ;;  %v5054_v22 = vld [vmem:[#allocation2 + $0xa0] sm:$0xff] }
  0x2f   :  { %4207 = vmatprep.subr.bf16.mxu0 %v6367_v0  ;;  %6541 = vst [vmem:[#allocation33_spill] sm:$0xff] %v5054_v22 }
  0x32   :  { %4209 = vmatpush1.bf16.msra.mxu0 %v4208_v25  ;;  %v5056_v25 = vld [vmem:[#allocation2 + $0xb8] sm:$0xff] }
  0x33   :  { %4210 = vmatprep.subr.bf16.mxu0 %v6367_v0  ;;  %6542 = vst [vmem:[#allocation34_spill] sm:$0xff] %v5056_v25 }
  0x36   :  { %4212 = vmatpush1.bf16.msra.mxu0 %v4211_v28  ;;  %v5060_v28 = vld [vmem:[#allocation2 + $0xb0] sm:$0xff] }
  0x37   :  { %4213 = vmatprep.subr.bf16.mxu0 %v6367_v0  ;;  %6543 = vst [vmem:[#allocation35_spill] sm:$0xff] %v5060_v28 }
  0x3a   :  { %4215 = vmatpush1.bf16.msra.mxu0 %v4214_v31  ;;  %v5062_v31 = vld [vmem:[#allocation2 + $0xc8] sm:$0xff] }
  0x3b   :  { %4216 = vmatprep.subr.bf16.mxu0 %v6367_v0  ;;  %6544 = vst [vmem:[#allocation36_spill] sm:$0xff] %v5062_v31 }
  0x3e   :  { %4218 = vmatpush1.bf16.msra.mxu0 %v4217_v34  ;;  %v5066_v34 = vld [vmem:[#allocation2 + $0xc0] sm:$0xff] }
  0x3f   :  { %4219 = vmatprep.subr.bf16.mxu0 %v6367_v0  ;;  %6545 = vst [vmem:[#allocation37_spill] sm:$0xff] %v5066_v34 }
  0x42   :  { %4221 = vmatpush1.bf16.msra.mxu0 %v4220_v37  ;;  %v5068_v37 = vld [vmem:[#allocation2 + $0xd8] sm:$0xff] }
  0x43   :  { %4222 = vmatprep.subr.bf16.mxu0 %v6367_v0  ;;  %6546 = vst [vmem:[#allocation38_spill] sm:$0xff] %v5068_v37 }
  0x46   :  { %4224 = vmatpush1.bf16.msra.mxu0 %v4223_v40  ;;  %v5072_v40 = vld [vmem:[#allocation2 + $0xd0] sm:$0xff] }
  0x47   :  { %4225 = vmatprep.subr.bf16.mxu0 %v6367_v0  ;;  %6547 = vst [vmem:[#allocation39_spill] sm:$0xff] %v5072_v40 }
  0x4a   :  { %4227 = vmatpush1.bf16.msra.mxu0 %v4226_v43  ;;  %v5074_v43 = vld [vmem:[#allocation2 + $0xe8] sm:$0xff] }
  0x4b   :  { %4228 = vmatprep.subr.bf16.mxu0 %v6367_v0  ;;  %6548 = vst [vmem:[#allocation40_spill] sm:$0xff] %v5074_v43 }
  0x4e   :  { %4230 = vmatpush1.bf16.msra.mxu0 %v4229_v46  ;;  %v5078_v46 = vld [vmem:[#allocation2 + $0xe0] sm:$0xff] }
  0x4f   :  { %4231 = vmatprep.subr.bf16.mxu0 %v6367_v0  ;;  %6549 = vst [vmem:[#allocation41_spill] sm:$0xff] %v5078_v46 }
  0x52   :  { %4233 = vmatpush1.bf16.msra.mxu0 %v4232_v49  ;;  %v5080_v49 = vld [vmem:[#allocation2 + $0xf8] sm:$0xff] }
  0x53   :  { %4282 = vmatprep.subr.bf16.mxu0 %v6367_v0  ;;  %6550 = vst [vmem:[#allocation42_spill] sm:$0xff] %v5080_v49  ;;  %v5084_v0 = vld [vmem:[#allocation2 + $0xf0] sm:$0xff] }
  0x54   :  { %6551 = vst [vmem:[#allocation43_spill] sm:$0xff] %v5084_v0 }
  0x55   :  { %221 = vmatmul.mubr.f32.vlgmr.msra.gmra.mrb[0].mxu0 %v4993_v50 }
  0x56   :  { %225 = vmatprep.mubr.f32.mxu0 %v4995_v51 }
  0x59   :  { %226 = vmatmul.mubr.f32.gmra.mrb[2].mxu0 %v5000_v52 }
  0x5a   :  { %230 = vmatprep.mubr.f32.mxu0 %v5002_v53 }
  0x5d   :  { %231 = vmatmul.mubr.f32.gmra.mrb[4].mxu0 %v5006_v54 }
  0x5e   :  { %235 = vmatprep.mubr.f32.mxu0 %v5008_v55 }
  0x61   :  { %236 = vmatmul.mubr.f32.gmra.mrb[6].mxu0 %v5012_v56 }
  0x62   :  { %240 = vmatprep.mubr.f32.mxu0 %v5014_v57 }
  0x65   :  { %241 = vmatmul.mubr.f32.gmra.mrb[8].mxu0 %v5018_v58 }
  0x66   :  { %245 = vmatprep.mubr.f32.mxu0 %v5020_v59 }
  0x69   :  { %246 = vmatmul.mubr.f32.gmra.mrb[10].mxu0 %v5024_v60 }
  0x6a   :  { %250 = vmatprep.mubr.f32.mxu0 %v5026_v61 }
  0x6d   :  { %251 = vmatmul.mubr.f32.gmra.mrb[12].mxu0 %v5030_v62 }
  0x6e   :  { %255 = vmatprep.mubr.f32.mxu0 %v5032_v63 }
  0x71   :  { %256 = vmatmul.mubr.f32.gmra.mrb[14].mxu0 %v5036_v4 }
  0x72   :  { %260 = vmatprep.mubr.f32.mxu0 %v5038_v6 }
  0x75   :  { %261 = vmatmul.mubr.f32.gmra.mrb[16].mxu0 %v5042_v9 }
  0x76   :  { %265 = vmatprep.mubr.f32.mxu0 %v5044_v13 }
  0x79   :  { %266 = vmatmul.mubr.f32.gmra.mrb[18].mxu0 %v5048_v16 }
  0x7a   :  { %270 = vmatprep.mubr.f32.mxu0 %v5050_v19 }
  0x7d   :  { %271 = vmatmul.mubr.f32.gmra.mrb[20].mxu0 %v5054_v22 }
  0x7e   :  { %275 = vmatprep.mubr.f32.mxu0 %v5056_v25 }
  0x81   :  { %276 = vmatmul.mubr.f32.gmra.mrb[22].mxu0 %v5060_v28 }
  0x82   :  { %280 = vmatprep.mubr.f32.mxu0 %v5062_v31 }
  0x85   :  { %281 = vmatmul.mubr.f32.gmra.mrb[24].mxu0 %v5066_v34  ;;  %v5086_v34 = vld [vmem:[#allocation2 + $0x108] sm:$0xff] }
  0x86   :  { %285 = vmatprep.mubr.f32.mxu0 %v5068_v37  ;;  %6552 = vst [vmem:[#allocation44_spill] sm:$0xff] %v5086_v34  ;;  %v5090_v37 = vld [vmem:[#allocation2 + $0x100] sm:$0xff] }
  0x87   :  { %6553 = vst [vmem:[#allocation45_spill] sm:$0xff] %v5090_v37 }
  0x89   :  { %286 = vmatmul.mubr.f32.gmra.mrb[26].mxu0 %v5072_v40  ;;  %v5092_v40 = vld [vmem:[#allocation2 + $0x118] sm:$0xff] }
  0x8a   :  { %290 = vmatprep.mubr.f32.mxu0 %v5074_v43  ;;  %6554 = vst [vmem:[#allocation46_spill] sm:$0xff] %v5092_v40  ;;  %v5096_v43 = vld [vmem:[#allocation2 + $0x110] sm:$0xff] }
  0x8b   :  { %6555 = vst [vmem:[#allocation47_spill] sm:$0xff] %v5096_v43 }
  0x8d   :  { %291 = vmatmul.mubr.f32.gmra.mrb[28].mxu0 %v5078_v46  ;;  %v5098_v46 = vld [vmem:[#allocation2 + $0x128] sm:$0xff] }
  0x8e   :  { %295 = vmatprep.mubr.f32.mxu0 %v5080_v49  ;;  %6556 = vst [vmem:[#allocation48_spill] sm:$0xff] %v5098_v46  ;;  %v5102_v49 = vld [vmem:[#allocation2 + $0x120] sm:$0xff] }
  0x8f   :  { %6557 = vst [vmem:[#allocation49_spill] sm:$0xff] %v5102_v49 }
  0x91   :  { %296 = vmatmul.mubr.f32.gmra.mrb[30].mxu0 %v5084_v0  ;;  %v5104_v0 = vld [vmem:[#allocation2 + $0x138] sm:$0xff] }
  0x92   :  { %300 = vmatprep.mubr.f32.mxu0 %v5086_v34  ;;  %6558 = vst [vmem:[#allocation50_spill] sm:$0xff] %v5104_v0  ;;  %v5108_v34 = vld [vmem:[#allocation2 + $0x130] sm:$0xff] }
  0x93   :  { %6559 = vst [vmem:[#allocation51_spill] sm:$0xff] %v5108_v34 }
  0x95   :  { %301 = vmatmul.mubr.f32.gmra.mrb[32].mxu0 %v5090_v37  ;;  %v5110_v37 = vld [vmem:[#allocation2 + $0x148] sm:$0xff] }
  0x96   :  { %305 = vmatprep.mubr.f32.mxu0 %v5092_v40  ;;  %6560 = vst [vmem:[#allocation52_spill] sm:$0xff] %v5110_v37  ;;  %v5114_v40 = vld [vmem:[#allocation2 + $0x140] sm:$0xff] }
  0x97   :  { %6561 = vst [vmem:[#allocation53_spill] sm:$0xff] %v5114_v40 }
  0x99   :  { %306 = vmatmul.mubr.f32.gmra.mrb[34].mxu0 %v5096_v43  ;;  %v5116_v43 = vld [vmem:[#allocation2 + $0x158] sm:$0xff] }
  0x9a   :  { %310 = vmatprep.mubr.f32.mxu0 %v5098_v46  ;;  %6562 = vst [vmem:[#allocation54_spill] sm:$0xff] %v5116_v43  ;;  %v5120_v46 = vld [vmem:[#allocation2 + $0x150] sm:$0xff] }
  0x9b   :  { %6563 = vst [vmem:[#allocation55_spill] sm:$0xff] %v5120_v46 }
  0x9d   :  { %311 = vmatmul.mubr.f32.gmra.mrb[36].mxu0 %v5102_v49  ;;  %v5122_v49 = vld [vmem:[#allocation2 + $0x168] sm:$0xff] }
  0x9e   :  { %315 = vmatprep.mubr.f32.mxu0 %v5104_v0  ;;  %6564 = vst [vmem:[#allocation56_spill] sm:$0xff] %v5122_v49  ;;  %v5131_v0 = vld [vmem:[#allocation2 + $0x178] sm:$0xff] }
  0x9f   :  { %6566 = vst [vmem:[#allocation58_spill] sm:$0xff] %v5131_v0 }
  0xa1   :  { %316 = vmatmul.mubr.f32.gmra.mrb[38].mxu0 %v5108_v34  ;;  %v381_v34 = vld [vmem:[%s6357_s4] sm:$0xff] }
  0xa2   :  { %320 = vmatprep.mubr.f32.mxu0 %v5110_v37  ;;  %v5129_v37 = vld [vmem:[#allocation2 + $0x160] sm:$0xff]  ;;  %3857 = vmatprep.subr.mxu1 %v381_v34 }
  0xa3   :  { %6565 = vst [vmem:[#allocation57_spill] sm:$0xff] %v5129_v37  ;;  %3858 = vmatpush3.msra.mxu1 %v381_v34  ;;  %v5147_v34 = vld [vmem:[#allocation2 + $0x190] sm:$0xff] }
  0xa4   :  { %6571 = vst [vmem:[#allocation63_spill] sm:$0xff] %v5147_v34 }
  0xa5   :  { %321 = vmatmul.mubr.f32.gmra.mrb[40].mxu0 %v5114_v40  ;;  %v5137_v40 = vld [vmem:[#allocation2 + $0x188] sm:$0xff] }
  0xa6   :  { %325 = vmatprep.mubr.f32.mxu0 %v5116_v43  ;;  %v5135_v43 = vld [vmem:[#allocation2 + $0x170] sm:$0xff]  ;;  %6568 = vst [vmem:[#allocation60_spill] sm:$0xff] %v5137_v40 }
  0xa7   :  { %6567 = vst [vmem:[#allocation59_spill] sm:$0xff] %v5135_v43 }
  0xa9   :  { %326 = vmatmul.mubr.f32.gmra.mrb[42].mxu0 %v5120_v46  ;;  %v5141_v46 = vld [vmem:[#allocation2 + $0x180] sm:$0xff] }
  0xaa   :  { %330 = vmatprep.mubr.f32.mxu0 %v5122_v49  ;;  %6569 = vst [vmem:[#allocation61_spill] sm:$0xff] %v5141_v46  ;;  %v5143_v49 = vld [vmem:[#allocation2 + $0x198] sm:$0xff] }
  0xab   :  { %6570 = vst [vmem:[#allocation62_spill] sm:$0xff] %v5143_v49 }
  0xad   :  { %331 = vmatmul.mubr.f32.gmra.mrb[44].mxu0 %v5129_v37  ;;  %v5149_v37 = vld [vmem:[#allocation2 + $0x1a8] sm:$0xff] }
  0xae   :  { %335 = vmatprep.mubr.f32.mxu0 %v5131_v0  ;;  %6572 = vst [vmem:[#allocation64_spill] sm:$0xff] %v5149_v37  ;;  %v5153_v0 = vld [vmem:[#allocation2 + $0x1a0] sm:$0xff] }
  0xaf   :  { %6573 = vst [vmem:[#allocation65_spill] sm:$0xff] %v5153_v0 }
  0xb1   :  { %336 = vmatmul.mubr.f32.gmra.mrb[46].mxu0 %v5135_v43  ;;  %v5155_v43 = vld [vmem:[#allocation2 + $0x1b8] sm:$0xff] }
  0xb2   :  { %340 = vmatprep.mubr.f32.mxu0 %v5137_v40  ;;  %6574 = vst [vmem:[#allocation66_spill] sm:$0xff] %v5155_v43  ;;  %v5159_v40 = vld [vmem:[#allocation2 + $0x1b0] sm:$0xff] }
  0xb3   :  { %6575 = vst [vmem:[#allocation67_spill] sm:$0xff] %v5159_v40 }
  0xb5   :  { %341 = vmatmul.mubr.f32.gmra.mrb[48].mxu0 %v5141_v46  ;;  %v5161_v46 = vld [vmem:[#allocation2 + $0x1c8] sm:$0xff] }
  0xb6   :  { %345 = vmatprep.mubr.f32.mxu0 %v5143_v49  ;;  %6576 = vst [vmem:[#allocation68_spill] sm:$0xff] %v5161_v46  ;;  %v5165_v49 = vld [vmem:[#allocation2 + $0x1c0] sm:$0xff] }
  0xb7   :  { %6577 = vst [vmem:[#allocation69_spill] sm:$0xff] %v5165_v49 }
  0xb9   :  { %346 = vmatmul.mubr.f32.gmra.mrb[50].mxu0 %v5147_v34  ;;  %v5167_v34 = vld [vmem:[#allocation2 + $0x1d8] sm:$0xff] }
  0xba   :  { %350 = vmatprep.mubr.f32.mxu0 %v5149_v37  ;;  %6578 = vst [vmem:[#allocation70_spill] sm:$0xff] %v5167_v34  ;;  %v5171_v37 = vld [vmem:[#allocation2 + $0x1d0] sm:$0xff] }
  0xbb   :  { %6579 = vst [vmem:[#allocation71_spill] sm:$0xff] %v5171_v37 }
  0xbd   :  { %351 = vmatmul.mubr.f32.gmra.mrb[52].mxu0 %v5153_v0  ;;  %v5173_v0 = vld [vmem:[#allocation2 + $0x1e8] sm:$0xff] }
  0xbe   :  { %355 = vmatprep.mubr.f32.mxu0 %v5155_v43  ;;  %6580 = vst [vmem:[#allocation72_spill] sm:$0xff] %v5173_v0  ;;  %v5177_v43 = vld [vmem:[#allocation2 + $0x1e0] sm:$0xff] }
  0xbf   :  { %6581 = vst [vmem:[#allocation73_spill] sm:$0xff] %v5177_v43 }
  0xc1   :  { %356 = vmatmul.mubr.f32.gmra.mrb[54].mxu0 %v5159_v40  ;;  %v5179_v40 = vld [vmem:[#allocation2 + $0x1f8] sm:$0xff] }
  0xc2   :  { %360 = vmatprep.mubr.f32.mxu0 %v5161_v46  ;;  %6582 = vst [vmem:[#allocation74_spill] sm:$0xff] %v5179_v40  ;;  %v5183_v46 = vld [vmem:[#allocation2 + $0x1f0] sm:$0xff] }
  0xc3   :  { %6583 = vst [vmem:[#allocation75_spill] sm:$0xff] %v5183_v46 }
  0xc5   :  { %361 = vmatmul.mubr.f32.gmra.mrb[56].mxu0 %v5165_v49  ;;  %v6584_v49 = vmov 0.0|0.0  }
  0xc6   :  { %365 = vmatprep.mubr.f32.mxu0 %v5167_v34 }
  0xc9   :  { %366 = vmatmul.mubr.f32.gmra.mrb[58].mxu0 %v5171_v37  ;;  %v155_v37 = vld [vmem:[%s6356_s3] sm:$0xff] }
  0xca   :  { %370 = vmatprep.mubr.f32.mxu0 %v5173_v0  ;;  %3907 = vmatprep.subr.mxu1 %v155_v37 }
  0xcd   :  { %371 = vmatmul.mubr.f32.gmra.mrb[60].mxu0 %v5177_v43 }
  0xce   :  { %375 = vmatprep.mubr.f32.mxu0 %v5179_v40 }
  0xd1   :  { %376 = vmatmul.mubr.f32.gmra.mrb[62].mxu0 %v5183_v46 }
  0xd2   :  { %1743 = vmatprep.mubr.f32.mxu0 %v4831_v12 }
 0x128   :  { %v5190_v0 = vpop.f32.mrb[0].mxu0 }
 0x129   :  { %v224_v34 = vpop.f32.mrb[1].mxu0  ;;  %3859 = vmatprep.mubr.msk.f32.mxu1 %vm382_vm0, %v5190_v0 }
 0x12c   :  { %v5194_v43 = vpop.f32.mrb[2].mxu0 }
 0x12d   :  { %v229_v46 = vpop.f32.mrb[3].mxu0  ;;  %3860 = vmatmul.mubr.msk.f32.vlgmr.msra.gmra.mrb[0].mxu1 %vm382_vm0, %v5194_v43 }
 0x12e   :  { %3908 = vmatpush3.msra.mxu1 %v155_v37 }
 0x12f   :  { %4234 = vmatprep.subr.bf16.mxu1 %v6584_v49 }
 0x130   :  { %v5201_v31 = vpop.f32.mrb[4].mxu0 }
 0x131   :  { %v234_v28 = vpop.f32.mrb[5].mxu0  ;;  %3862 = vmatprep.mubr.msk.f32.mxu1 %vm382_vm0, %v5201_v31 }
 0x134   :  { %v5205_v34 = vpop.f32.mrb[6].mxu0 }
 0x135   :  { %v239_v22 = vpop.f32.mrb[7].mxu0  ;;  %3863 = vmatmul.mubr.msk.f32.gmra.mrb[2].mxu1 %vm382_vm0, %v5205_v34 }
 0x138   :  { %v5211_v46 = vpop.f32.mrb[8].mxu0 }
 0x139   :  { %v244_v37 = vpop.f32.mrb[9].mxu0  ;;  %3865 = vmatprep.mubr.msk.f32.mxu1 %vm382_vm0, %v5211_v46 }
 0x13c   :  { %v5215_v40 = vpop.f32.mrb[10].mxu0 }
 0x13d   :  { %v249_v19 = vpop.f32.mrb[11].mxu0  ;;  %3866 = vmatmul.mubr.msk.f32.gmra.mrb[4].mxu1 %vm382_vm0, %v5215_v40 }
 0x140   :  { %v5221_v25 = vpop.f32.mrb[12].mxu0 }
 0x141   :  { %v254_v22 = vpop.f32.mrb[13].mxu0  ;;  %3868 = vmatprep.mubr.msk.f32.mxu1 %vm382_vm0, %v5221_v25 }
 0x144   :  { %v5225_v16 = vpop.f32.mrb[14].mxu0 }
 0x145   :  { %v259_v13 = vpop.f32.mrb[15].mxu0  ;;  %3869 = vmatmul.mubr.msk.f32.gmra.mrb[6].mxu1 %vm382_vm0, %v5225_v16 }
 0x148   :  { %v5231_v28 = vpop.f32.mrb[16].mxu0 }
 0x149   :  { %v264_v19 = vpop.f32.mrb[17].mxu0  ;;  %3871 = vmatprep.mubr.msk.f32.mxu1 %vm382_vm0, %v5231_v28 }
 0x14c   :  { %v5235_v9 = vpop.f32.mrb[18].mxu0 }
 0x14d   :  { %v269_v6 = vpop.f32.mrb[19].mxu0  ;;  %3872 = vmatmul.mubr.msk.f32.gmra.mrb[8].mxu1 %vm382_vm0, %v5235_v9 }
 0x150   :  { %v5241_v37 = vpop.f32.mrb[20].mxu0 }
 0x151   :  { %v274_v13 = vpop.f32.mrb[21].mxu0  ;;  %3874 = vmatprep.mubr.msk.f32.mxu1 %vm382_vm0, %v5241_v37 }
 0x154   :  { %v5245_v4 = vpop.f32.mrb[22].mxu0 }
 0x155   :  { %v279_v63 = vpop.f32.mrb[23].mxu0  ;;  %3875 = vmatmul.mubr.msk.f32.gmra.mrb[10].mxu1 %vm382_vm0, %v5245_v4 }
 0x158   :  { %v5251_v22 = vpop.f32.mrb[24].mxu0 }
 0x159   :  { %v284_v6 = vpop.f32.mrb[25].mxu0  ;;  %3877 = vmatprep.mubr.msk.f32.mxu1 %vm382_vm0, %v5251_v22 }
 0x15c   :  { %v5255_v62 = vpop.f32.mrb[26].mxu0 }
 0x15d   :  { %v289_v61 = vpop.f32.mrb[27].mxu0  ;;  %3878 = vmatmul.mubr.msk.f32.gmra.mrb[12].mxu1 %vm382_vm0, %v5255_v62 }
 0x160   :  { %v5261_v19 = vpop.f32.mrb[28].mxu0 }
 0x161   :  { %v294_v63 = vpop.f32.mrb[29].mxu0  ;;  %3880 = vmatprep.mubr.msk.f32.mxu1 %vm382_vm0, %v5261_v19 }
 0x164   :  { %v5265_v60 = vpop.f32.mrb[30].mxu0 }
 0x165   :  { %v299_v59 = vpop.f32.mrb[31].mxu0  ;;  %3881 = vmatmul.mubr.msk.f32.gmra.mrb[14].mxu1 %vm382_vm0, %v5265_v60 }
 0x168   :  { %v5271_v13 = vpop.f32.mrb[32].mxu0 }
 0x169   :  { %v304_v61 = vpop.f32.mrb[33].mxu0  ;;  %3883 = vmatprep.mubr.msk.f32.mxu1 %vm382_vm0, %v5271_v13 }
 0x16c   :  { %v5275_v58 = vpop.f32.mrb[34].mxu0 }
 0x16d   :  { %v309_v57 = vpop.f32.mrb[35].mxu0  ;;  %3884 = vmatmul.mubr.msk.f32.gmra.mrb[16].mxu1 %vm382_vm0, %v5275_v58 }
 0x170   :  { %v5281_v6 = vpop.f32.mrb[36].mxu0 }
 0x171   :  { %v314_v59 = vpop.f32.mrb[37].mxu0  ;;  %3886 = vmatprep.mubr.msk.f32.mxu1 %vm382_vm0, %v5281_v6 }
 0x174   :  { %v5285_v56 = vpop.f32.mrb[38].mxu0 }
 0x175   :  { %v319_v55 = vpop.f32.mrb[39].mxu0  ;;  %3887 = vmatmul.mubr.msk.f32.gmra.mrb[18].mxu1 %vm382_vm0, %v5285_v56 }
 0x178   :  { %v5291_v63 = vpop.f32.mrb[40].mxu0 }
 0x179   :  { %v324_v57 = vpop.f32.mrb[41].mxu0  ;;  %3889 = vmatprep.mubr.msk.f32.mxu1 %vm382_vm0, %v5291_v63 }
 0x17c   :  { %v5295_v54 = vpop.f32.mrb[42].mxu0 }
 0x17d   :  { %v329_v53 = vpop.f32.mrb[43].mxu0  ;;  %3890 = vmatmul.mubr.msk.f32.gmra.mrb[20].mxu1 %vm382_vm0, %v5295_v54 }
 0x180   :  { %v5301_v61 = vpop.f32.mrb[44].mxu0 }
 0x181   :  { %v334_v55 = vpop.f32.mrb[45].mxu0  ;;  %3892 = vmatprep.mubr.msk.f32.mxu1 %vm382_vm0, %v5301_v61 }
 0x184   :  { %v5305_v52 = vpop.f32.mrb[46].mxu0 }
 0x185   :  { %v339_v51 = vpop.f32.mrb[47].mxu0  ;;  %3893 = vmatmul.mubr.msk.f32.gmra.mrb[22].mxu1 %vm382_vm0, %v5305_v52 }
 0x188   :  { %v5311_v59 = vpop.f32.mrb[48].mxu0 }
 0x189   :  { %v344_v53 = vpop.f32.mrb[49].mxu0  ;;  %3895 = vmatprep.mubr.msk.f32.mxu1 %vm382_vm0, %v5311_v59 }
 0x18c   :  { %v5315_v50 = vpop.f32.mrb[50].mxu0 }
 0x18d   :  { %v349_v12 = vpop.f32.mrb[51].mxu0  ;;  %3896 = vmatmul.mubr.msk.f32.gmra.mrb[24].mxu1 %vm382_vm0, %v5315_v50 }
 0x190   :  { %v5321_v57 = vpop.f32.mrb[52].mxu0 }
 0x191   :  { %6585 = vst [vmem:[#allocation76_spill] sm:$0xff] %v5321_v57  ;;  %v354_v51 = vpop.f32.mrb[53].mxu0  ;;  %3898 = vmatprep.mubr.msk.f32.mxu1 %vm382_vm0, %v5321_v57 }
 0x194   :  { %v5325_v48 = vpop.f32.mrb[54].mxu0 }
 0x195   :  { %6586 = vst [vmem:[#allocation77_spill] sm:$0xff] %v5325_v48  ;;  %v359_v47 = vpop.f32.mrb[55].mxu0  ;;  %3899 = vmatmul.mubr.msk.f32.gmra.mrb[26].mxu1 %vm382_vm0, %v5325_v48 }
 0x198   :  { %v5331_v55 = vpop.f32.mrb[56].mxu0 }
 0x199   :  { %v364_v12 = vpop.f32.mrb[57].mxu0  ;;  %3901 = vmatprep.mubr.msk.f32.mxu1 %vm382_vm0, %v5331_v55 }
 0x19c   :  { %v5335_v45 = vpop.f32.mrb[58].mxu0 }
 0x19d   :  { %v4277_v51 = vpack.c.bf16 %v5335_v45, %v5331_v55  ;;  %v369_v44 = vpop.f32.mrb[59].mxu0  ;;  %3902 = vmatmul.mubr.msk.f32.gmra.mrb[28].mxu1 %vm382_vm0, %v5335_v45  ;;  %v6618_v45 = vld [vmem:[#allocation23_spill] sm:$0xff]  ;;  %v6645_v55 = vld [vmem:[#allocation50_spill] sm:$0xff] }
 0x19e   :  { %v6587_v44 = vpack.c.bf16 %v5194_v43, %v5190_v0  ;;  %v6589_v0 = vpack.c.bf16 %v5215_v40, %v5211_v46  ;;  %v6631_v40 = vld [vmem:[#allocation36_spill] sm:$0xff]  ;;  %v6632_v43 = vld [vmem:[#allocation37_spill] sm:$0xff]  ;;  %v6634_v46 = vld [vmem:[#allocation39_spill] sm:$0xff] }
 0x1a0   :  { %v5341_v53 = vpop.f32.mrb[60].mxu0 }
 0x1a1   :  { %v374_v47 = vpop.f32.mrb[61].mxu0  ;;  %3904 = vmatprep.mubr.msk.f32.mxu1 %vm382_vm0, %v5341_v53 }
 0x1a2   :  { %v6648_v47 = vld [vmem:[#allocation53_spill] sm:$0xff] }
 0x1a4   :  { %v5345_v57 = vpop.f32.mrb[62].mxu0 }
 0x1a5   :  { %v4280_v12 = vpack.c.bf16 %v5345_v57, %v5341_v53  ;;  %v379_v48 = vpop.f32.mrb[63].mxu0  ;;  %3905 = vmatmul.mubr.msk.f32.gmra.mrb[30].mxu1 %vm382_vm0, %v5345_v57  ;;  %v6644_v57 = vld [vmem:[#allocation49_spill] sm:$0xff]  ;;  %v6646_v53 = vld [vmem:[#allocation51_spill] sm:$0xff] }
 0x1a6   :  { %3909 = vmatprep.mubr.msk.f32.mxu1 %vm382_vm0, %v4786_v1  ;;  %v6588_v48 = vpack.c.bf16 %v5205_v34, %v5201_v31  ;;  %v6590_v1 = vpack.c.bf16 %v5225_v16, %v5221_v25  ;;  %v6628_v16 = vld [vmem:[#allocation33_spill] sm:$0xff]  ;;  %v6629_v25 = vld [vmem:[#allocation34_spill] sm:$0xff]  ;;  %v6630_v31 = vld [vmem:[#allocation35_spill] sm:$0xff] }
 0x1a7   :  { %v6633_v34 = vld [vmem:[#allocation38_spill] sm:$0xff] }
 0x1a9   :  { %3910 = vmatmul.mubr.msk.f32.vlgmr.msra.gmra.mrb[0].mxu1 %vm382_vm0, %v4791_v2  ;;  %v6591_v2 = vpack.c.bf16 %v5235_v9, %v5231_v28  ;;  %v6627_v9 = vld [vmem:[#allocation32_spill] sm:$0xff] }
 0x1aa   :  { %4236 = vmatpush1.bf16.msra.mxu1 %v6587_v44  ;;  %3912 = vmatprep.mubr.msk.f32.mxu1 %vm382_vm0, %v4796_v3  ;;  %v6592_v3 = vpack.c.bf16 %v5245_v4, %v5241_v37  ;;  %v6626_v4 = vld [vmem:[#allocation31_spill] sm:$0xff]  ;;  %v6635_v28 = vld [vmem:[#allocation40_spill] sm:$0xff]  ;;  %v6636_v37 = vld [vmem:[#allocation41_spill] sm:$0xff] }
 0x1ab   :  { %4237 = vmatprep.subr.bf16.mxu1 %v6584_v49  ;;  %v6650_v44 = vld [vmem:[#allocation55_spill] sm:$0xff] }
 0x1ad   :  { %3913 = vmatmul.mubr.msk.f32.gmra.mrb[2].mxu1 %vm382_vm0, %v4803_v5  ;;  %v6593_v5 = vpack.c.bf16 %v5255_v62, %v5251_v22  ;;  %v6625_v62 = vld [vmem:[#allocation30_spill] sm:$0xff] }
 0x1ae   :  { %4239 = vmatpush1.bf16.msra.mxu1 %v6588_v48  ;;  %3915 = vmatprep.mubr.msk.f32.mxu1 %vm382_vm0, %v4811_v7  ;;  %v6594_v7 = vpack.c.bf16 %v5265_v60, %v5261_v19  ;;  %v6624_v60 = vld [vmem:[#allocation29_spill] sm:$0xff]  ;;  %v6637_v22 = vld [vmem:[#allocation42_spill] sm:$0xff]  ;;  %v6638_v19 = vld [vmem:[#allocation43_spill] sm:$0xff] }
 0x1af   :  { %4240 = vmatprep.subr.bf16.mxu1 %v6584_v49  ;;  %v1250_v48 = vld [vmem:[%s6358_s5] sm:$0xff] }
 0x1b1   :  { %3916 = vmatmul.mubr.msk.f32.gmra.mrb[4].mxu1 %vm382_vm0, %v4816_v8  ;;  %v6595_v8 = vpack.c.bf16 %v5275_v58, %v5271_v13  ;;  %v6623_v58 = vld [vmem:[#allocation28_spill] sm:$0xff] }
 0x1b2   :  { %4242 = vmatpush1.bf16.msra.mxu1 %v6589_v0  ;;  %3918 = vmatprep.mubr.msk.f32.mxu1 %vm382_vm0, %v4824_v10  ;;  %v6596_v10 = vpack.c.bf16 %v5285_v56, %v5281_v6  ;;  %v6622_v56 = vld [vmem:[#allocation27_spill] sm:$0xff]  ;;  %v6639_v13 = vld [vmem:[#allocation44_spill] sm:$0xff]  ;;  %v6640_v6 = vld [vmem:[#allocation45_spill] sm:$0xff] }
 0x1b3   :  { %4243 = vmatprep.subr.bf16.mxu1 %v6584_v49  ;;  %v6651_v0 = vld [vmem:[#allocation56_spill] sm:$0xff] }
 0x1b5   :  { %3919 = vmatmul.mubr.msk.f32.gmra.mrb[6].mxu1 %vm382_vm0, %v4829_v11  ;;  %v6597_v11 = vpack.c.bf16 %v5295_v54, %v5291_v63  ;;  %v6621_v54 = vld [vmem:[#allocation26_spill] sm:$0xff] }
 0x1b6   :  { %4245 = vmatpush1.bf16.msra.mxu1 %v6590_v1  ;;  %3921 = vmatprep.mubr.msk.f32.mxu1 %vm382_vm0, %v4840_v14  ;;  %v6598_v14 = vpack.c.bf16 %v5305_v52, %v5301_v61  ;;  %v6620_v52 = vld [vmem:[#allocation25_spill] sm:$0xff]  ;;  %v6641_v63 = vld [vmem:[#allocation46_spill] sm:$0xff]  ;;  %v6642_v61 = vld [vmem:[#allocation47_spill] sm:$0xff] }
 0x1b7   :  { %4246 = vmatprep.subr.bf16.mxu1 %v6584_v49  ;;  %v6652_v1 = vld [vmem:[#allocation57_spill] sm:$0xff] }
 0x1b9   :  { %3922 = vmatmul.mubr.msk.f32.gmra.mrb[8].mxu1 %vm382_vm0, %v4845_v15  ;;  %v6599_v15 = vpack.c.bf16 %v5315_v50, %v5311_v59  ;;  %v6619_v50 = vld [vmem:[#allocation24_spill] sm:$0xff] }
 0x1ba   :  { %4248 = vmatpush1.bf16.msra.mxu1 %v6591_v2  ;;  %3924 = vmatprep.mubr.msk.f32.mxu1 %vm382_vm0, %v4853_v17  ;;  %v6600_v17 = vld [vmem:[#allocation77_spill] sm:$0xff]  ;;  %v6643_v59 = vld [vmem:[#allocation48_spill] sm:$0xff]  ;;  %v6653_v2 = vld [vmem:[#allocation58_spill] sm:$0xff] }
 0x1bb   :  { %4249 = vmatprep.subr.bf16.mxu1 %v6584_v49 }
 0x1bd   :  { %3925 = vmatmul.mubr.msk.f32.gmra.mrb[10].mxu1 %vm382_vm0, %v4858_v18  ;;  %v6601_v18 = vld [vmem:[#allocation76_spill] sm:$0xff] }
 0x1be   :  { %4251 = vmatpush1.bf16.msra.mxu1 %v6592_v3  ;;  %3927 = vmatprep.mubr.msk.f32.mxu1 %vm382_vm0, %v4866_v20  ;;  %v6602_v20 = vpack.c.bf16 %v6600_v17, %v6601_v18  ;;  %v6654_v3 = vld [vmem:[#allocation59_spill] sm:$0xff]  ;;  %v6663_v18 = vld [vmem:[#allocation68_spill] sm:$0xff] }
 0x1bf   :  { %4252 = vmatprep.subr.bf16.mxu1 %v6584_v49  ;;  %v6662_v17 = vld [vmem:[#allocation67_spill] sm:$0xff] }
 0x1c1   :  { %3928 = vmatmul.mubr.msk.f32.gmra.mrb[12].mxu1 %vm382_vm0, %v4871_v21  ;;  %v6603_v21 = vld [vmem:[#allocation9_spill] sm:$0xff] }
 0x1c2   :  { %4254 = vmatpush1.bf16.msra.mxu1 %v6593_v5  ;;  %3930 = vmatprep.mubr.msk.f32.mxu1 %vm382_vm0, %v4879_v23  ;;  %v6604_v23 = vld [vmem:[#allocation10_spill] sm:$0xff]  ;;  %v6655_v5 = vld [vmem:[#allocation60_spill] sm:$0xff] }
 0x1c3   :  { %4255 = vmatprep.subr.bf16.mxu1 %v6584_v49 }
 0x1c5   :  { %3931 = vmatmul.mubr.msk.f32.gmra.mrb[14].mxu1 %vm382_vm0, %v4884_v24  ;;  %v6605_v24 = vld [vmem:[#allocation11_spill] sm:$0xff] }
 0x1c6   :  { %4257 = vmatpush1.bf16.msra.mxu1 %v6594_v7  ;;  %3933 = vmatprep.mubr.msk.f32.mxu1 %vm382_vm0, %v4892_v26  ;;  %v6606_v26 = vld [vmem:[#allocation12_spill] sm:$0xff]  ;;  %v6656_v7 = vld [vmem:[#allocation61_spill] sm:$0xff] }
 0x1c7   :  { %4258 = vmatprep.subr.bf16.mxu1 %v6584_v49 }
 0x1c9   :  { %3934 = vmatmul.mubr.msk.f32.gmra.mrb[16].mxu1 %vm382_vm0, %v4897_v27  ;;  %v6607_v27 = vld [vmem:[#allocation8_spill] sm:$0xff] }
 0x1ca   :  { %4260 = vmatpush1.bf16.msra.mxu1 %v6595_v8  ;;  %3936 = vmatprep.mubr.msk.f32.mxu1 %vm382_vm0, %v4905_v29  ;;  %v6608_v29 = vld [vmem:[#allocation13_spill] sm:$0xff]  ;;  %v6657_v8 = vld [vmem:[#allocation62_spill] sm:$0xff] }
 0x1cb   :  { %4261 = vmatprep.subr.bf16.mxu1 %v6584_v49 }
 0x1cd   :  { %3937 = vmatmul.mubr.msk.f32.gmra.mrb[18].mxu1 %vm382_vm0, %v4910_v30  ;;  %v6609_v30 = vld [vmem:[#allocation14_spill] sm:$0xff] }
 0x1ce   :  { %4263 = vmatpush1.bf16.msra.mxu1 %v6596_v10  ;;  %3939 = vmatprep.mubr.msk.f32.mxu1 %vm382_vm0, %v4918_v32  ;;  %v6610_v32 = vld [vmem:[#allocation15_spill] sm:$0xff] }
 0x1cf   :  { %4264 = vmatprep.subr.bf16.mxu1 %v6584_v49  ;;  %v6658_v10 = vld [vmem:[#allocation63_spill] sm:$0xff] }
 0x1d1   :  { %3940 = vmatmul.mubr.msk.f32.gmra.mrb[20].mxu1 %vm382_vm0, %v4923_v33  ;;  %v6611_v33 = vld [vmem:[#allocation16_spill] sm:$0xff] }
 0x1d2   :  { %4266 = vmatpush1.bf16.msra.mxu1 %v6597_v11  ;;  %3942 = vmatprep.mubr.msk.f32.mxu1 %vm382_vm0, %v4931_v35  ;;  %v6612_v35 = vld [vmem:[#allocation17_spill] sm:$0xff]  ;;  %v6659_v11 = vld [vmem:[#allocation64_spill] sm:$0xff] }
 0x1d3   :  { %4267 = vmatprep.subr.bf16.mxu1 %v6584_v49 }
 0x1d5   :  { %3943 = vmatmul.mubr.msk.f32.gmra.mrb[22].mxu1 %vm382_vm0, %v4936_v36  ;;  %v6613_v36 = vld [vmem:[#allocation18_spill] sm:$0xff] }
 0x1d6   :  { %4269 = vmatpush1.bf16.msra.mxu1 %v6598_v14  ;;  %3945 = vmatprep.mubr.msk.f32.mxu1 %vm382_vm0, %v4944_v38  ;;  %v6614_v38 = vld [vmem:[#allocation19_spill] sm:$0xff]  ;;  %v6660_v14 = vld [vmem:[#allocation65_spill] sm:$0xff] }
 0x1d7   :  { %4270 = vmatprep.subr.bf16.mxu1 %v6584_v49 }
 0x1d9   :  { %3946 = vmatmul.mubr.msk.f32.gmra.mrb[24].mxu1 %vm382_vm0, %v4949_v39  ;;  %v6615_v39 = vld [vmem:[#allocation20_spill] sm:$0xff] }
 0x1da   :  { %4272 = vmatpush1.bf16.msra.mxu1 %v6599_v15  ;;  %3948 = vmatprep.mubr.msk.f32.mxu1 %vm382_vm0, %v4957_v41  ;;  %v6616_v41 = vld [vmem:[#allocation21_spill] sm:$0xff]  ;;  %v6661_v15 = vld [vmem:[#allocation66_spill] sm:$0xff] }
 0x1db   :  { %4273 = vmatprep.subr.bf16.mxu1 %v6584_v49 }
 0x1dd   :  { %3949 = vmatmul.mubr.msk.f32.gmra.mrb[26].mxu1 %vm382_vm0, %v4962_v42  ;;  %v6617_v42 = vld [vmem:[#allocation22_spill] sm:$0xff] }
 0x1de   :  { %4275 = vmatpush1.bf16.msra.mxu1 %v6602_v20  ;;  %3951 = vmatprep.mubr.msk.f32.mxu1 %vm382_vm0, %v6603_v21  ;;  %v6664_v20 = vld [vmem:[#allocation69_spill] sm:$0xff]  ;;  %v6665_v21 = vld [vmem:[#allocation70_spill] sm:$0xff] }
 0x1df   :  { %4276 = vmatprep.subr.bf16.mxu1 %v6584_v49 }
 0x1e1   :  { %3952 = vmatmul.mubr.msk.f32.gmra.mrb[28].mxu1 %vm382_vm0, %v6604_v23  ;;  %v6666_v23 = vld [vmem:[#allocation71_spill] sm:$0xff] }
 0x1e2   :  { %4278 = vmatpush1.bf16.msra.mxu1 %v4277_v51  ;;  %3954 = vmatprep.mubr.msk.f32.mxu1 %vm382_vm0, %v6605_v24  ;;  %v6647_v51 = vld [vmem:[#allocation52_spill] sm:$0xff] }
 0x1e3   :  { %4279 = vmatprep.subr.bf16.mxu1 %v6584_v49  ;;  %v6667_v24 = vld [vmem:[#allocation72_spill] sm:$0xff] }
 0x1e5   :  { %3955 = vmatmul.mubr.msk.f32.gmra.mrb[30].mxu1 %vm382_vm0, %v6606_v26  ;;  %v6668_v26 = vld [vmem:[#allocation73_spill] sm:$0xff] }
 0x1e6   :  { %4281 = vmatpush1.bf16.msra.mxu1 %v4280_v12  ;;  %1089 = vmatprep.mubr.f32.mxu1 %v6607_v27  ;;  %v6649_v12 = vld [vmem:[#allocation54_spill] sm:$0xff] }
 0x1e7   :  { %3957 = vmatprep.subr.mxu1 %v1250_v48  ;;  %v6669_v27 = vld [vmem:[#allocation74_spill] sm:$0xff] }
 0x1e9   :  { %1090 = vmatmul.mubr.f32.vlgmr.msra.gmra.mrb[32].mxu1 %v6608_v29  ;;  %v6670_v29 = vld [vmem:[#allocation75_spill] sm:$0xff] }
 0x1ea   :  { %1094 = vmatprep.mubr.f32.mxu1 %v6609_v30  ;;  %3958 = vmatpush3.msra.mxu1 %v1250_v48 }
 0x1eb   :  { %4346 = vmatprep.subr.bf16.mxu1 %v6584_v49 }
 0x1ed   :  { %1095 = vmatmul.mubr.f32.gmra.mrb[34].mxu1 %v6610_v32 }
 0x1ee   :  { %1099 = vmatprep.mubr.f32.mxu1 %v6611_v33 }
 0x1f1   :  { %1100 = vmatmul.mubr.f32.gmra.mrb[36].mxu1 %v6612_v35 }
 0x1f2   :  { %1104 = vmatprep.mubr.f32.mxu1 %v6613_v36 }
 0x1f5   :  { %1105 = vmatmul.mubr.f32.gmra.mrb[38].mxu1 %v6614_v38 }
 0x1f6   :  { %1109 = vmatprep.mubr.f32.mxu1 %v6615_v39 }
 0x1f9   :  { %1110 = vmatmul.mubr.f32.gmra.mrb[40].mxu1 %v6616_v41 }
 0x1fa   :  { %1114 = vmatprep.mubr.f32.mxu1 %v6617_v42 }
 0x1fd   :  { %1115 = vmatmul.mubr.f32.gmra.mrb[42].mxu1 %v6618_v45 }
 0x1fe   :  { %1119 = vmatprep.mubr.f32.mxu1 %v6619_v50 }
 0x201   :  { %1120 = vmatmul.mubr.f32.gmra.mrb[44].mxu1 %v6620_v52 }
 0x202   :  { %1124 = vmatprep.mubr.f32.mxu1 %v6621_v54 }
 0x205   :  { %1125 = vmatmul.mubr.f32.gmra.mrb[46].mxu1 %v6622_v56 }
 0x206   :  { %1129 = vmatprep.mubr.f32.mxu1 %v6623_v58 }
 0x209   :  { %1130 = vmatmul.mubr.f32.gmra.mrb[48].mxu1 %v6624_v60 }
 0x20a   :  { %1134 = vmatprep.mubr.f32.mxu1 %v6625_v62 }
 0x20d   :  { %1135 = vmatmul.mubr.f32.gmra.mrb[50].mxu1 %v6626_v4 }
 0x20e   :  { %1139 = vmatprep.mubr.f32.mxu1 %v6627_v9 }
 0x211   :  { %1140 = vmatmul.mubr.f32.gmra.mrb[52].mxu1 %v6628_v16 }
 0x212   :  { %1144 = vmatprep.mubr.f32.mxu1 %v6629_v25 }
 0x215   :  { %1145 = vmatmul.mubr.f32.gmra.mrb[54].mxu1 %v6630_v31 }
 0x216   :  { %1149 = vmatprep.mubr.f32.mxu1 %v6631_v40 }
 0x219   :  { %1150 = vmatmul.mubr.f32.gmra.mrb[56].mxu1 %v6632_v43 }
 0x21a   :  { %1154 = vmatprep.mubr.f32.mxu1 %v6633_v34 }
 0x21d   :  { %1155 = vmatmul.mubr.f32.gmra.mrb[58].mxu1 %v6634_v46 }
 0x21e   :  { %1159 = vmatprep.mubr.f32.mxu1 %v6635_v28 }
 0x221   :  { %1160 = vmatmul.mubr.f32.gmra.mrb[60].mxu1 %v6636_v37 }
 0x222   :  { %1164 = vmatprep.mubr.f32.mxu1 %v6637_v22 }
 0x225   :  { %1165 = vmatmul.mubr.f32.gmra.mrb[62].mxu1 %v6638_v19 }
 0x226   :  { %1169 = vmatprep.mubr.f32.mxu1 %v6639_v13 }
 0x229   :  { %1170 = vmatmul.mubr.f32.gmra.mrb[64].mxu1 %v6640_v6 }
 0x22a   :  { %1174 = vmatprep.mubr.f32.mxu1 %v6641_v63 }
 0x22d   :  { %1175 = vmatmul.mubr.f32.gmra.mrb[66].mxu1 %v6642_v61 }
 0x22e   :  { %1179 = vmatprep.mubr.f32.mxu1 %v6643_v59 }
 0x231   :  { %1180 = vmatmul.mubr.f32.gmra.mrb[68].mxu1 %v6644_v57 }
 0x232   :  { %1184 = vmatprep.mubr.f32.mxu1 %v6645_v55 }
 0x235   :  { %1185 = vmatmul.mubr.f32.gmra.mrb[70].mxu1 %v6646_v53 }
 0x236   :  { %1189 = vmatprep.mubr.f32.mxu1 %v6647_v51 }
 0x239   :  { %1190 = vmatmul.mubr.f32.gmra.mrb[72].mxu1 %v6648_v47 }
 0x23a   :  { %1194 = vmatprep.mubr.f32.mxu1 %v6649_v12 }
 0x23d   :  { %1195 = vmatmul.mubr.f32.gmra.mrb[74].mxu1 %v6650_v44 }
 0x23e   :  { %1199 = vmatprep.mubr.f32.mxu1 %v6651_v0 }
 0x241   :  { %1200 = vmatmul.mubr.f32.gmra.mrb[76].mxu1 %v6652_v1 }
 0x242   :  { %1204 = vmatprep.mubr.f32.mxu1 %v6653_v2 }
 0x245   :  { %1205 = vmatmul.mubr.f32.gmra.mrb[78].mxu1 %v6654_v3 }
 0x246   :  { %1209 = vmatprep.mubr.f32.mxu1 %v6655_v5 }
 0x249   :  { %1210 = vmatmul.mubr.f32.gmra.mrb[80].mxu1 %v6656_v7 }
 0x24a   :  { %1214 = vmatprep.mubr.f32.mxu1 %v6657_v8 }
 0x24d   :  { %1215 = vmatmul.mubr.f32.gmra.mrb[82].mxu1 %v6658_v10 }
 0x24e   :  { %1219 = vmatprep.mubr.f32.mxu1 %v6659_v11 }
 0x251   :  { %1220 = vmatmul.mubr.f32.gmra.mrb[84].mxu1 %v6660_v14 }
 0x252   :  { %1224 = vmatprep.mubr.f32.mxu1 %v6661_v15 }
 0x255   :  { %1225 = vmatmul.mubr.f32.gmra.mrb[86].mxu1 %v6662_v17 }
 0x256   :  { %1229 = vmatprep.mubr.f32.mxu1 %v6663_v18 }
 0x259   :  { %1230 = vmatmul.mubr.f32.gmra.mrb[88].mxu1 %v6664_v20 }
 0x25a   :  { %1234 = vmatprep.mubr.f32.mxu1 %v6665_v21 }
 0x25d   :  { %1235 = vmatmul.mubr.f32.gmra.mrb[90].mxu1 %v6666_v23 }
 0x25e   :  { %1239 = vmatprep.mubr.f32.mxu1 %v6667_v24 }
 0x261   :  { %1240 = vmatmul.mubr.f32.gmra.mrb[92].mxu1 %v6668_v26 }
 0x262   :  { %1244 = vmatprep.mubr.f32.mxu1 %v6669_v27 }
 0x265   :  { %1245 = vmatmul.mubr.f32.gmra.mrb[94].mxu1 %v6670_v29 }
 0x2bc   :  { %v1091_v30 = vpop.f32.mrb[32].mxu1 }
 0x2bd   :  { %v1093_v32 = vpop.f32.mrb[33].mxu1  ;;  %3959 = vmatprep.mubr.msk.f32.mxu1 %vm382_vm0, %v1091_v30 }
 0x2be   :  { %v4581_v32 = vld [vmem:[#allocation2 + $0x8] sm:$0xff] }
 0x2c0   :  { %v1096_v33 = vpop.f32.mrb[34].mxu1 }
 0x2c1   :  { %v1098_v35 = vpop.f32.mrb[35].mxu1  ;;  %3960 = vmatmul.mubr.msk.f32.vlgmr.msra.gmra.mrb[0].mxu1 %vm382_vm0, %v1096_v33  ;;  %v5581_v33 = vld [vmem:[%s6359_s6] ss:$0 sm:$0xff] }
 0x2c4   :  { %v1101_v36 = vpop.f32.mrb[36].mxu1 }
 0x2c5   :  { %v1103_v38 = vpop.f32.mrb[37].mxu1  ;;  %3962 = vmatprep.mubr.msk.f32.mxu1 %vm382_vm0, %v1101_v36 }
 0x2c8   :  { %v1106_v39 = vpop.f32.mrb[38].mxu1 }
 0x2c9   :  { %v1108_v41 = vpop.f32.mrb[39].mxu1  ;;  %3963 = vmatmul.mubr.msk.f32.gmra.mrb[2].mxu1 %vm382_vm0, %v1106_v39 }
 0x2cc   :  { %v1111_v42 = vpop.f32.mrb[40].mxu1 }
 0x2cd   :  { %v1113_v45 = vpop.f32.mrb[41].mxu1  ;;  %3965 = vmatprep.mubr.msk.f32.mxu1 %vm382_vm0, %v1111_v42 }
 0x2d0   :  { %v1116_v50 = vpop.f32.mrb[42].mxu1 }
 0x2d1   :  { %v1118_v52 = vpop.f32.mrb[43].mxu1  ;;  %3966 = vmatmul.mubr.msk.f32.gmra.mrb[4].mxu1 %vm382_vm0, %v1116_v50 }
 0x2d4   :  { %v1121_v54 = vpop.f32.mrb[44].mxu1 }
 0x2d5   :  { %v1123_v56 = vpop.f32.mrb[45].mxu1  ;;  %3968 = vmatprep.mubr.msk.f32.mxu1 %vm382_vm0, %v1121_v54 }
 0x2d8   :  { %v1126_v58 = vpop.f32.mrb[46].mxu1 }
 0x2d9   :  { %v1128_v60 = vpop.f32.mrb[47].mxu1  ;;  %3969 = vmatmul.mubr.msk.f32.gmra.mrb[6].mxu1 %vm382_vm0, %v1126_v58 }
 0x2dc   :  { %v1131_v62 = vpop.f32.mrb[48].mxu1 }
 0x2dd   :  { %v1133_v4 = vpop.f32.mrb[49].mxu1  ;;  %3971 = vmatprep.mubr.msk.f32.mxu1 %vm382_vm0, %v1131_v62 }
 0x2e0   :  { %v1136_v9 = vpop.f32.mrb[50].mxu1 }
 0x2e1   :  { %v1138_v16 = vpop.f32.mrb[51].mxu1  ;;  %3972 = vmatmul.mubr.msk.f32.gmra.mrb[8].mxu1 %vm382_vm0, %v1136_v9 }
 0x2e4   :  { %v1141_v25 = vpop.f32.mrb[52].mxu1 }
 0x2e5   :  { %v1143_v31 = vpop.f32.mrb[53].mxu1  ;;  %3974 = vmatprep.mubr.msk.f32.mxu1 %vm382_vm0, %v1141_v25 }
 0x2e8   :  { %v1146_v40 = vpop.f32.mrb[54].mxu1 }
 0x2e9   :  { %v1148_v43 = vpop.f32.mrb[55].mxu1  ;;  %3975 = vmatmul.mubr.msk.f32.gmra.mrb[10].mxu1 %vm382_vm0, %v1146_v40 }
 0x2ec   :  { %v1151_v34 = vpop.f32.mrb[56].mxu1 }
 0x2ed   :  { %v1153_v46 = vpop.f32.mrb[57].mxu1  ;;  %3977 = vmatprep.mubr.msk.f32.mxu1 %vm382_vm0, %v1151_v34 }
 0x2f0   :  { %v1156_v28 = vpop.f32.mrb[58].mxu1 }
 0x2f1   :  { %v1158_v37 = vpop.f32.mrb[59].mxu1  ;;  %3978 = vmatmul.mubr.msk.f32.gmra.mrb[12].mxu1 %vm382_vm0, %v1156_v28 }
 0x2f4   :  { %v1161_v22 = vpop.f32.mrb[60].mxu1 }
 0x2f5   :  { %v1163_v19 = vpop.f32.mrb[61].mxu1  ;;  %3980 = vmatprep.mubr.msk.f32.mxu1 %vm382_vm0, %v1161_v22 }
 0x2f8   :  { %v1166_v13 = vpop.f32.mrb[62].mxu1 }
 0x2f9   :  { %v1168_v6 = vpop.f32.mrb[63].mxu1  ;;  %3981 = vmatmul.mubr.msk.f32.gmra.mrb[14].mxu1 %vm382_vm0, %v1166_v13 }
 0x2fc   :  { %v1171_v63 = vpop.f32.mrb[64].mxu1 }
 0x2fd   :  { %v1173_v61 = vpop.f32.mrb[65].mxu1  ;;  %3983 = vmatprep.mubr.msk.f32.mxu1 %vm382_vm0, %v1171_v63 }
 0x300   :  { %v1176_v59 = vpop.f32.mrb[66].mxu1 }
 0x301   :  { %v1178_v57 = vpop.f32.mrb[67].mxu1  ;;  %3984 = vmatmul.mubr.msk.f32.gmra.mrb[16].mxu1 %vm382_vm0, %v1176_v59 }
 0x304   :  { %v1181_v55 = vpop.f32.mrb[68].mxu1 }
 0x305   :  { %v1183_v53 = vpop.f32.mrb[69].mxu1  ;;  %3986 = vmatprep.mubr.msk.f32.mxu1 %vm382_vm0, %v1181_v55 }
 0x308   :  { %v1186_v51 = vpop.f32.mrb[70].mxu1 }
 0x309   :  { %v1188_v47 = vpop.f32.mrb[71].mxu1  ;;  %3987 = vmatmul.mubr.msk.f32.gmra.mrb[18].mxu1 %vm382_vm0, %v1186_v51 }
 0x30c   :  { %v1191_v12 = vpop.f32.mrb[72].mxu1 }
 0x30d   :  { %v1193_v44 = vpop.f32.mrb[73].mxu1  ;;  %3989 = vmatprep.mubr.msk.f32.mxu1 %vm382_vm0, %v1191_v12 }
 0x310   :  { %v1196_v48 = vpop.f32.mrb[74].mxu1 }
 0x311   :  { %v1198_v0 = vpop.f32.mrb[75].mxu1  ;;  %3990 = vmatmul.mubr.msk.f32.gmra.mrb[20].mxu1 %vm382_vm0, %v1196_v48 }
 0x314   :  { %v1201_v1 = vpop.f32.mrb[76].mxu1 }
 0x315   :  { %v1203_v2 = vpop.f32.mrb[77].mxu1  ;;  %3992 = vmatprep.mubr.msk.f32.mxu1 %vm382_vm0, %v1201_v1 }
 0x318   :  { %v1206_v3 = vpop.f32.mrb[78].mxu1 }
 0x319   :  { %v1208_v5 = vpop.f32.mrb[79].mxu1  ;;  %3993 = vmatmul.mubr.msk.f32.gmra.mrb[22].mxu1 %vm382_vm0, %v1206_v3 }
 0x31c   :  { %v1211_v7 = vpop.f32.mrb[80].mxu1 }
 0x31d   :  { %v1213_v8 = vpop.f32.mrb[81].mxu1  ;;  %3995 = vmatprep.mubr.msk.f32.mxu1 %vm382_vm0, %v1211_v7 }
 0x320   :  { %v1216_v10 = vpop.f32.mrb[82].mxu1 }
 0x321   :  { %v1218_v11 = vpop.f32.mrb[83].mxu1  ;;  %3996 = vmatmul.mubr.msk.f32.gmra.mrb[24].mxu1 %vm382_vm0, %v1216_v10 }
 0x324   :  { %v1221_v14 = vpop.f32.mrb[84].mxu1 }
 0x325   :  { %v1223_v15 = vpop.f32.mrb[85].mxu1  ;;  %3998 = vmatprep.mubr.msk.f32.mxu1 %vm382_vm0, %v1221_v14 }
 0x328   :  { %v1226_v17 = vpop.f32.mrb[86].mxu1 }
 0x329   :  { %v1228_v18 = vpop.f32.mrb[87].mxu1  ;;  %3999 = vmatmul.mubr.msk.f32.gmra.mrb[26].mxu1 %vm382_vm0, %v1226_v17 }
 0x32c   :  { %v1231_v20 = vpop.f32.mrb[88].mxu1 }
 0x32d   :  { %v1233_v21 = vpop.f32.mrb[89].mxu1  ;;  %4001 = vmatprep.mubr.msk.f32.mxu1 %vm382_vm0, %v1231_v20 }
 0x330   :  { %v1236_v23 = vpop.f32.mrb[90].mxu1 }
 0x331   :  { %v1238_v24 = vpop.f32.mrb[91].mxu1  ;;  %4002 = vmatmul.mubr.msk.f32.gmra.mrb[28].mxu1 %vm382_vm0, %v1236_v23 }
 0x334   :  { %v1241_v26 = vpop.f32.mrb[92].mxu1 }
 0x335   :  { %v1243_v27 = vpop.f32.mrb[93].mxu1  ;;  %4004 = vmatprep.mubr.msk.f32.mxu1 %vm382_vm0, %v1241_v26 }
 0x338   :  { %v1246_v29 = vpop.f32.mrb[94].mxu1 }
 0x339   :  { %v1248_v30 = vpop.f32.mrb[95].mxu1  ;;  %4005 = vmatmul.mubr.msk.f32.gmra.mrb[30].mxu1 %vm382_vm0, %v1246_v29 }
 0x33a   :  { %2615 = vmatprep.mubr.f32.mxu1 %v4581_v32 }
 0x394   :  { %v3961_v35 = vpop.f32.mrb[0].mxu1 }
 0x395   :  { %v5584_v36 = vadd.f32 %v3961_v35, %v5581_v33  ;;  %v1413_v38 = vpop.f32.mrb[1].mxu1 }
 0x396   :  { %v5587_v39 = vadd.f32 %v5581_v33, %v1413_v38 }
 0x397   :  { %v6469_v41 = vmax.f32 %v5584_v36, 0.0 }
 0x398   :  { %v6470_v42 = vmax.f32 %v5587_v39, 0.0 }
 0x39a   :  { %v4283_v45 = vpack.c.bf16 %v6469_v41, %v6470_v42  ;;  %v5883_v41 = vld [vmem:[#allocation2 + $0xf8] sm:$0xff]  ;;  %v5886_v42 = vld [vmem:[#allocation2 + $0xf0] sm:$0xff] }
 0x39b   :  { %6682 = vst [vmem:[#allocation17_spill] sm:$0xff] %v5883_v41  ;;  %6683 = vst [vmem:[#allocation18_spill] sm:$0xff] %v5886_v42 }
 0x39c   :  { %v3964_v50 = vpop.f32.mrb[2].mxu1  ;;  %4284 = vmatpush1.bf16.msra.mxu0 %v4283_v45 }
 0x39d   :  { %v5596_v52 = vadd.f32 %v3964_v50, %v5581_v33  ;;  %v1423_v54 = vpop.f32.mrb[3].mxu1  ;;  %4285 = vmatprep.subr.bf16.mxu0 %v6584_v49 }
 0x39e   :  { %v5600_v56 = vadd.f32 %v5581_v33, %v1423_v54 }
 0x39f   :  { %v6467_v58 = vmax.f32 %v5596_v52, 0.0 }
 0x3a0   :  { %v6468_v60 = vmax.f32 %v5600_v56, 0.0 }
 0x3a2   :  { %v4286_v62 = vpack.c.bf16 %v6467_v58, %v6468_v60  ;;  %v5877_v58 = vld [vmem:[#allocation2 + $0xe8] sm:$0xff]  ;;  %v5880_v60 = vld [vmem:[#allocation2 + $0xe0] sm:$0xff] }
 0x3a3   :  { %6680 = vst [vmem:[#allocation15_spill] sm:$0xff] %v5877_v58  ;;  %6681 = vst [vmem:[#allocation16_spill] sm:$0xff] %v5880_v60 }
 0x3a4   :  { %v3967_v4 = vpop.f32.mrb[4].mxu1  ;;  %4287 = vmatpush1.bf16.msra.mxu0 %v4286_v62 }
 0x3a5   :  { %v5609_v9 = vadd.f32 %v3967_v4, %v5581_v33  ;;  %v1433_v16 = vpop.f32.mrb[5].mxu1  ;;  %4288 = vmatprep.subr.bf16.mxu0 %v6584_v49 }
 0x3a6   :  { %v5613_v25 = vadd.f32 %v5581_v33, %v1433_v16 }
 0x3a7   :  { %v6465_v31 = vmax.f32 %v5609_v9, 0.0 }
 0x3a8   :  { %v6466_v40 = vmax.f32 %v5613_v25, 0.0 }
 0x3aa   :  { %v4289_v43 = vpack.c.bf16 %v6465_v31, %v6466_v40  ;;  %v5871_v31 = vld [vmem:[#allocation2 + $0xd8] sm:$0xff]  ;;  %v5874_v40 = vld [vmem:[#allocation2 + $0xd0] sm:$0xff] }
 0x3ab   :  { %6678 = vst [vmem:[#allocation13_spill] sm:$0xff] %v5871_v31  ;;  %6679 = vst [vmem:[#allocation14_spill] sm:$0xff] %v5874_v40 }
 0x3ac   :  { %v3970_v34 = vpop.f32.mrb[6].mxu1  ;;  %4290 = vmatpush1.bf16.msra.mxu0 %v4289_v43 }
 0x3ad   :  { %v5622_v46 = vadd.f32 %v3970_v34, %v5581_v33  ;;  %v1443_v28 = vpop.f32.mrb[7].mxu1  ;;  %4291 = vmatprep.subr.bf16.mxu0 %v6584_v49 }
 0x3ae   :  { %v5626_v37 = vadd.f32 %v5581_v33, %v1443_v28 }
 0x3af   :  { %v6463_v22 = vmax.f32 %v5622_v46, 0.0 }
 0x3b0   :  { %v6464_v19 = vmax.f32 %v5626_v37, 0.0 }
 0x3b2   :  { %v4292_v13 = vpack.c.bf16 %v6463_v22, %v6464_v19  ;;  %v5865_v22 = vld [vmem:[#allocation2 + $0xc8] sm:$0xff]  ;;  %v5868_v19 = vld [vmem:[#allocation2 + $0xc0] sm:$0xff] }
 0x3b3   :  { %6677 = vst [vmem:[#allocation8_spill] sm:$0xff] %v5868_v19 }
 0x3b4   :  { %v3973_v6 = vpop.f32.mrb[8].mxu1  ;;  %4293 = vmatpush1.bf16.msra.mxu0 %v4292_v13 }
 0x3b5   :  { %v5635_v63 = vadd.f32 %v3973_v6, %v5581_v33  ;;  %v1453_v61 = vpop.f32.mrb[9].mxu1  ;;  %4294 = vmatprep.subr.bf16.mxu0 %v6584_v49 }
 0x3b6   :  { %v5639_v59 = vadd.f32 %v5581_v33, %v1453_v61 }
 0x3b7   :  { %v6461_v57 = vmax.f32 %v5635_v63, 0.0 }
 0x3b8   :  { %v6462_v55 = vmax.f32 %v5639_v59, 0.0 }
 0x3ba   :  { %v4295_v53 = vpack.c.bf16 %v6461_v57, %v6462_v55  ;;  %v5859_v57 = vld [vmem:[#allocation2 + $0xb8] sm:$0xff]  ;;  %v5862_v55 = vld [vmem:[#allocation2 + $0xb0] sm:$0xff] }
 0x3bc   :  { %v3976_v51 = vpop.f32.mrb[10].mxu1  ;;  %4296 = vmatpush1.bf16.msra.mxu0 %v4295_v53 }
 0x3bd   :  { %v5648_v47 = vadd.f32 %v3976_v51, %v5581_v33  ;;  %v1463_v12 = vpop.f32.mrb[11].mxu1  ;;  %4297 = vmatprep.subr.bf16.mxu0 %v6584_v49 }
 0x3be   :  { %v5652_v44 = vadd.f32 %v5581_v33, %v1463_v12 }
 0x3bf   :  { %v6459_v48 = vmax.f32 %v5648_v47, 0.0 }
 0x3c0   :  { %v6460_v0 = vmax.f32 %v5652_v44, 0.0 }
 0x3c2   :  { %v4298_v1 = vpack.c.bf16 %v6459_v48, %v6460_v0  ;;  %v5853_v48 = vld [vmem:[#allocation2 + $0xa8] sm:$0xff]  ;;  %v5856_v0 = vld [vmem:[#allocation2 + $0xa0] sm:$0xff] }
 0x3c4   :  { %v3979_v2 = vpop.f32.mrb[12].mxu1  ;;  %4299 = vmatpush1.bf16.msra.mxu0 %v4298_v1 }
 0x3c5   :  { %v5661_v3 = vadd.f32 %v3979_v2, %v5581_v33  ;;  %v1473_v5 = vpop.f32.mrb[13].mxu1  ;;  %4300 = vmatprep.subr.bf16.mxu0 %v6584_v49 }
 0x3c6   :  { %v5665_v7 = vadd.f32 %v5581_v33, %v1473_v5 }
 0x3c7   :  { %v6457_v8 = vmax.f32 %v5661_v3, 0.0 }
 0x3c8   :  { %v6458_v10 = vmax.f32 %v5665_v7, 0.0 }
 0x3ca   :  { %v4301_v11 = vpack.c.bf16 %v6457_v8, %v6458_v10  ;;  %v5847_v8 = vld [vmem:[#allocation2 + $0x98] sm:$0xff]  ;;  %v5850_v10 = vld [vmem:[#allocation2 + $0x90] sm:$0xff] }
 0x3cc   :  { %v3982_v14 = vpop.f32.mrb[14].mxu1  ;;  %4302 = vmatpush1.bf16.msra.mxu0 %v4301_v11 }
 0x3cd   :  { %v5674_v15 = vadd.f32 %v3982_v14, %v5581_v33  ;;  %v1483_v17 = vpop.f32.mrb[15].mxu1  ;;  %4303 = vmatprep.subr.bf16.mxu0 %v6584_v49 }
 0x3ce   :  { %v5678_v18 = vadd.f32 %v5581_v33, %v1483_v17 }
 0x3cf   :  { %v6455_v20 = vmax.f32 %v5674_v15, 0.0 }
 0x3d0   :  { %v6456_v21 = vmax.f32 %v5678_v18, 0.0 }
 0x3d2   :  { %v4304_v23 = vpack.c.bf16 %v6455_v20, %v6456_v21  ;;  %v5841_v20 = vld [vmem:[#allocation2 + $0x88] sm:$0xff]  ;;  %v5844_v21 = vld [vmem:[#allocation2 + $0x80] sm:$0xff] }
 0x3d4   :  { %v3985_v24 = vpop.f32.mrb[16].mxu1  ;;  %4305 = vmatpush1.bf16.msra.mxu0 %v4304_v23 }
 0x3d5   :  { %v5687_v26 = vadd.f32 %v3985_v24, %v5581_v33  ;;  %v1493_v27 = vpop.f32.mrb[17].mxu1  ;;  %4306 = vmatprep.subr.bf16.mxu0 %v6584_v49 }
 0x3d6   :  { %v5691_v29 = vadd.f32 %v5581_v33, %v1493_v27 }
 0x3d7   :  { %v6453_v30 = vmax.f32 %v5687_v26, 0.0 }
 0x3d8   :  { %v6454_v32 = vmax.f32 %v5691_v29, 0.0 }
 0x3da   :  { %v4307_v35 = vpack.c.bf16 %v6453_v30, %v6454_v32  ;;  %v5835_v30 = vld [vmem:[#allocation2 + $0x78] sm:$0xff]  ;;  %v5838_v32 = vld [vmem:[#allocation2 + $0x70] sm:$0xff] }
 0x3dc   :  { %v3988_v38 = vpop.f32.mrb[18].mxu1  ;;  %4308 = vmatpush1.bf16.msra.mxu0 %v4307_v35 }
 0x3dd   :  { %v5700_v45 = vadd.f32 %v3988_v38, %v5581_v33  ;;  %v1503_v50 = vpop.f32.mrb[19].mxu1  ;;  %4309 = vmatprep.subr.bf16.mxu0 %v6584_v49 }
 0x3de   :  { %v5704_v54 = vadd.f32 %v5581_v33, %v1503_v50 }
 0x3df   :  { %v6451_v62 = vmax.f32 %v5700_v45, 0.0 }
 0x3e0   :  { %v6452_v4 = vmax.f32 %v5704_v54, 0.0 }
 0x3e2   :  { %v4310_v16 = vpack.c.bf16 %v6451_v62, %v6452_v4  ;;  %v5829_v62 = vld [vmem:[#allocation2 + $0x68] sm:$0xff]  ;;  %v5832_v4 = vld [vmem:[#allocation2 + $0x60] sm:$0xff] }
 0x3e4   :  { %v3991_v43 = vpop.f32.mrb[20].mxu1  ;;  %4311 = vmatpush1.bf16.msra.mxu0 %v4310_v16 }
 0x3e5   :  { %v5713_v34 = vadd.f32 %v3991_v43, %v5581_v33  ;;  %v1513_v28 = vpop.f32.mrb[21].mxu1  ;;  %4312 = vmatprep.subr.bf16.mxu0 %v6584_v49 }
 0x3e6   :  { %v5717_v13 = vadd.f32 %v5581_v33, %v1513_v28 }
 0x3e7   :  { %v6449_v6 = vmax.f32 %v5713_v34, 0.0 }
 0x3e8   :  { %v6450_v61 = vmax.f32 %v5717_v13, 0.0 }
 0x3ea   :  { %v4313_v53 = vpack.c.bf16 %v6449_v6, %v6450_v61  ;;  %v5823_v6 = vld [vmem:[#allocation2 + $0x58] sm:$0xff]  ;;  %v5826_v61 = vld [vmem:[#allocation2 + $0x50] sm:$0xff] }
 0x3ec   :  { %v3994_v51 = vpop.f32.mrb[22].mxu1  ;;  %4314 = vmatpush1.bf16.msra.mxu0 %v4313_v53 }
 0x3ed   :  { %v5726_v12 = vadd.f32 %v3994_v51, %v5581_v33  ;;  %v1523_v1 = vpop.f32.mrb[23].mxu1  ;;  %4315 = vmatprep.subr.bf16.mxu0 %v6584_v49 }
 0x3ee   :  { %v5730_v2 = vadd.f32 %v5581_v33, %v1523_v1 }
 0x3ef   :  { %v6443_v5 = vmax.f32 %v5726_v12, 0.0 }
 0x3f0   :  { %v6448_v11 = vmax.f32 %v5730_v2, 0.0 }
 0x3f2   :  { %v4316_v14 = vpack.c.bf16 %v6443_v5, %v6448_v11  ;;  %v5820_v11 = vld [vmem:[#allocation2 + $0x40] sm:$0xff] }
 0x3f4   :  { %v3997_v17 = vpop.f32.mrb[24].mxu1  ;;  %4317 = vmatpush1.bf16.msra.mxu0 %v4316_v14 }
 0x3f5   :  { %v5739_v23 = vadd.f32 %v3997_v17, %v5581_v33  ;;  %v1533_v24 = vpop.f32.mrb[25].mxu1  ;;  %4318 = vmatprep.subr.bf16.mxu0 %v6584_v49 }
 0x3f6   :  { %v5743_v27 = vadd.f32 %v5581_v33, %v1533_v24 }
 0x3f7   :  { %v6439_v35 = vmax.f32 %v5739_v23, 0.0 }
 0x3f8   :  { %v6442_v38 = vmax.f32 %v5743_v27, 0.0 }
 0x3fa   :  { %v4319_v50 = vpack.c.bf16 %v6439_v35, %v6442_v38 }
 0x3fc   :  { %v4000_v16 = vpop.f32.mrb[26].mxu1  ;;  %4320 = vmatpush1.bf16.msra.mxu0 %v4319_v50 }
 0x3fd   :  { %v5752_v43 = vadd.f32 %v4000_v16, %v5581_v33  ;;  %v1543_v28 = vpop.f32.mrb[27].mxu1  ;;  %4321 = vmatprep.subr.bf16.mxu0 %v6584_v49 }
 0x3fe   :  { %v5756_v53 = vadd.f32 %v5581_v33, %v1543_v28 }
 0x3ff   :  { %6671 = vst [vmem:[#allocation77_spill] sm:$0xff] %v5752_v43  ;;  %v6440_v51 = vmax.f32 %v5752_v43, 0.0 }
 0x400   :  { %6672 = vst [vmem:[#allocation76_spill] sm:$0xff] %v5756_v53  ;;  %v6441_v1 = vmax.f32 %v5756_v53, 0.0 }
 0x402   :  { %v4322_v14 = vpack.c.bf16 %v6440_v51, %v6441_v1 }
 0x404   :  { %v4003_v17 = vpop.f32.mrb[28].mxu1  ;;  %4323 = vmatpush1.bf16.msra.mxu0 %v4322_v14 }
 0x405   :  { %v5765_v24 = vadd.f32 %v4003_v17, %v5581_v33  ;;  %v1553_v50 = vpop.f32.mrb[29].mxu1  ;;  %4324 = vmatprep.subr.bf16.mxu0 %v6584_v49 }
 0x406   :  { %v5769_v16 = vadd.f32 %v5581_v33, %v1553_v50 }
 0x407   :  { %6673 = vst [vmem:[#allocation9_spill] sm:$0xff] %v5765_v24  ;;  %v6444_v28 = vmax.f32 %v5765_v24, 0.0  ;;  %v5895_v24 = vld [vmem:[#allocation2 + $0x118] sm:$0xff] }
 0x408   :  { %6674 = vst [vmem:[#allocation10_spill] sm:$0xff] %v5769_v16  ;;  %v6445_v35 = vmax.f32 %v5769_v16, 0.0  ;;  %6686 = vst [vmem:[#allocation21_spill] sm:$0xff] %v5895_v24 }
 0x40a   :  { %v4325_v51 = vpack.c.bf16 %v6444_v28, %v6445_v35  ;;  %v5799_v35 = vld [vmem:[#allocation2 + $0x18] sm:$0xff] }
 0x40c   :  { %v4006_v1 = vpop.f32.mrb[30].mxu1  ;;  %4326 = vmatpush1.bf16.msra.mxu0 %v4325_v51  ;;  %v1904_v51 = vld [vmem:[%s6361_s8] sm:$0xff] }
 0x40d   :  { %v5778_v14 = vadd.f32 %v4006_v1, %v5581_v33  ;;  %v1563_v17 = vpop.f32.mrb[31].mxu1  ;;  %4327 = vmatprep.subr.bf16.mxu0 %v6584_v49  ;;  %v1905_v1 = vld [vmem:[%s6361_s8 + $0x8] sm:$0xff] }
 0x40e   :  { %v5782_v50 = vadd.f32 %v5581_v33, %v1563_v17  ;;  %v4330_v33 = vpack.c.bf16 %v1905_v1, %v1904_v51  ;;  %v5796_v17 = vld [vmem:[#allocation2] sm:$0xff]  ;;  %v5811_v51 = vld [vmem:[#allocation2 + $0x38] sm:$0xff]  ;;  %v5814_v1 = vld [vmem:[#allocation2 + $0x30] sm:$0xff] }
 0x40f   :  { %6675 = vst [vmem:[#allocation11_spill] sm:$0xff] %v5778_v14  ;;  %v6446_v38 = vmax.f32 %v5778_v14, 0.0  ;;  %v5889_v14 = vld [vmem:[#allocation2 + $0x108] sm:$0xff] }
 0x410   :  { %6676 = vst [vmem:[#allocation12_spill] sm:$0xff] %v5782_v50  ;;  %v6447_v5 = vmax.f32 %v5782_v50, 0.0  ;;  %6684 = vst [vmem:[#allocation19_spill] sm:$0xff] %v5889_v14  ;;  %v5892_v50 = vld [vmem:[#allocation2 + $0x100] sm:$0xff] }
 0x411   :  { %6685 = vst [vmem:[#allocation20_spill] sm:$0xff] %v5892_v50 }
 0x412   :  { %v4328_v28 = vpack.c.bf16 %v6446_v38, %v6447_v5  ;;  %v5802_v38 = vld [vmem:[#allocation2 + $0x10] sm:$0xff]  ;;  %v5805_v5 = vld [vmem:[#allocation2 + $0x28] sm:$0xff] }
 0x414   :  { %4329 = vmatpush1.bf16.msra.mxu0 %v4328_v28  ;;  %v5808_v28 = vld [vmem:[#allocation2 + $0x20] sm:$0xff] }
 0x415   :  { %4331 = vmatprep.subr.bf16.mxu0 %v4330_v33 }
 0x417   :  { %1744 = vmatmul.mubr.f32.vlgmr.msra.gmra.mrb[64].mxu0 %v5796_v17 }
 0x418   :  { %1748 = vmatprep.mubr.f32.mxu0 %v5799_v35  ;;  %4333 = vmatpush3.bf16.msra.mxu0 %v4330_v33  ;;  %v5817_v33 = vld [vmem:[#allocation2 + $0x48] sm:$0xff] }
 0x41b   :  { %1749 = vmatmul.mubr.f32.gmra.mrb[66].mxu0 %v5802_v38 }
 0x41c   :  { %1753 = vmatprep.mubr.f32.mxu0 %v5805_v5 }
 0x41f   :  { %1754 = vmatmul.mubr.f32.gmra.mrb[68].mxu0 %v5808_v28 }
 0x420   :  { %1758 = vmatprep.mubr.f32.mxu0 %v5811_v51 }
 0x423   :  { %1759 = vmatmul.mubr.f32.gmra.mrb[70].mxu0 %v5814_v1 }
 0x424   :  { %1763 = vmatprep.mubr.f32.mxu0 %v5817_v33 }
 0x427   :  { %1764 = vmatmul.mubr.f32.gmra.mrb[72].mxu0 %v5820_v11 }
 0x428   :  { %1768 = vmatprep.mubr.f32.mxu0 %v5823_v6 }
 0x42b   :  { %1769 = vmatmul.mubr.f32.gmra.mrb[74].mxu0 %v5826_v61 }
 0x42c   :  { %1773 = vmatprep.mubr.f32.mxu0 %v5829_v62 }
 0x42f   :  { %1774 = vmatmul.mubr.f32.gmra.mrb[76].mxu0 %v5832_v4 }
 0x430   :  { %1778 = vmatprep.mubr.f32.mxu0 %v5835_v30 }
 0x433   :  { %1779 = vmatmul.mubr.f32.gmra.mrb[78].mxu0 %v5838_v32 }
 0x434   :  { %1783 = vmatprep.mubr.f32.mxu0 %v5841_v20 }
 0x437   :  { %1784 = vmatmul.mubr.f32.gmra.mrb[80].mxu0 %v5844_v21 }
 0x438   :  { %1788 = vmatprep.mubr.f32.mxu0 %v5847_v8 }
 0x43b   :  { %1789 = vmatmul.mubr.f32.gmra.mrb[82].mxu0 %v5850_v10 }
 0x43c   :  { %1793 = vmatprep.mubr.f32.mxu0 %v5853_v48 }
 0x43f   :  { %1794 = vmatmul.mubr.f32.gmra.mrb[84].mxu0 %v5856_v0 }
 0x440   :  { %1798 = vmatprep.mubr.f32.mxu0 %v5859_v57 }
 0x443   :  { %1799 = vmatmul.mubr.f32.gmra.mrb[86].mxu0 %v5862_v55 }
 0x444   :  { %1803 = vmatprep.mubr.f32.mxu0 %v5865_v22 }
 0x447   :  { %1804 = vmatmul.mubr.f32.gmra.mrb[88].mxu0 %v5868_v19 }
 0x448   :  { %1808 = vmatprep.mubr.f32.mxu0 %v5871_v31 }
 0x44b   :  { %1809 = vmatmul.mubr.f32.gmra.mrb[90].mxu0 %v5874_v40  ;;  %v5940_v40 = vld [vmem:[#allocation2 + $0x170] sm:$0xff] }
 0x44c   :  { %1813 = vmatprep.mubr.f32.mxu0 %v5877_v58  ;;  %v5928_v58 = vld [vmem:[#allocation2 + $0x150] sm:$0xff]  ;;  %6699 = vst [vmem:[#allocation34_spill] sm:$0xff] %v5940_v40 }
 0x44d   :  { %6695 = vst [vmem:[#allocation30_spill] sm:$0xff] %v5928_v58 }
 0x44f   :  { %1814 = vmatmul.mubr.f32.gmra.mrb[92].mxu0 %v5880_v60  ;;  %v5898_v60 = vld [vmem:[#allocation2 + $0x110] sm:$0xff] }
 0x450   :  { %1818 = vmatprep.mubr.f32.mxu0 %v5883_v41  ;;  %6687 = vst [vmem:[#allocation22_spill] sm:$0xff] %v5898_v60  ;;  %v5901_v41 = vld [vmem:[#allocation2 + $0x128] sm:$0xff] }
 0x451   :  { %6688 = vst [vmem:[#allocation23_spill] sm:$0xff] %v5901_v41 }
 0x453   :  { %1819 = vmatmul.mubr.f32.gmra.mrb[94].mxu0 %v5886_v42  ;;  %v5904_v42 = vld [vmem:[#allocation2 + $0x120] sm:$0xff] }
 0x454   :  { %1823 = vmatprep.mubr.f32.mxu0 %v5889_v14  ;;  %6689 = vst [vmem:[#allocation24_spill] sm:$0xff] %v5904_v42  ;;  %v5907_v14 = vld [vmem:[#allocation2 + $0x138] sm:$0xff] }
 0x455   :  { %6690 = vst [vmem:[#allocation25_spill] sm:$0xff] %v5907_v14 }
 0x457   :  { %1824 = vmatmul.mubr.f32.gmra.mrb[96].mxu0 %v5892_v50  ;;  %v5910_v50 = vld [vmem:[#allocation2 + $0x130] sm:$0xff] }
 0x458   :  { %1828 = vmatprep.mubr.f32.mxu0 %v5895_v24  ;;  %6691 = vst [vmem:[#allocation26_spill] sm:$0xff] %v5910_v50  ;;  %v5913_v24 = vld [vmem:[#allocation2 + $0x148] sm:$0xff] }
 0x459   :  { %6692 = vst [vmem:[#allocation27_spill] sm:$0xff] %v5913_v24 }
 0x45b   :  { %1829 = vmatmul.mubr.f32.gmra.mrb[98].mxu0 %v5898_v60  ;;  %v5916_v60 = vld [vmem:[#allocation2 + $0x140] sm:$0xff] }
 0x45c   :  { %1833 = vmatprep.mubr.f32.mxu0 %v5901_v41  ;;  %6693 = vst [vmem:[#allocation28_spill] sm:$0xff] %v5916_v60  ;;  %v5919_v41 = vld [vmem:[#allocation2 + $0x158] sm:$0xff] }
 0x45d   :  { %6694 = vst [vmem:[#allocation29_spill] sm:$0xff] %v5919_v41 }
 0x45f   :  { %1834 = vmatmul.mubr.f32.gmra.mrb[100].mxu0 %v5904_v42 }
 0x460   :  { %1838 = vmatprep.mubr.f32.mxu0 %v5907_v14  ;;  %v1906_v14 = vld [vmem:[%s6361_s8 + $0x10] sm:$0xff] }
 0x463   :  { %1839 = vmatmul.mubr.f32.gmra.mrb[102].mxu0 %v5910_v50  ;;  %v1907_v50 = vld [vmem:[%s6361_s8 + $0x18] sm:$0xff] }
 0x464   :  { %1843 = vmatprep.mubr.f32.mxu0 %v5913_v24  ;;  %v4334_v42 = vpack.c.bf16 %v1907_v50, %v1906_v14  ;;  %v5931_v24 = vld [vmem:[#allocation2 + $0x168] sm:$0xff]  ;;  %v5946_v50 = vld [vmem:[#allocation2 + $0x180] sm:$0xff] }
 0x465   :  { %6696 = vst [vmem:[#allocation31_spill] sm:$0xff] %v5931_v24  ;;  %v5943_v14 = vld [vmem:[#allocation2 + $0x188] sm:$0xff]  ;;  %6701 = vst [vmem:[#allocation36_spill] sm:$0xff] %v5946_v50 }
 0x466   :  { %4335 = vmatprep.subr.bf16.mxu0 %v4334_v42  ;;  %6700 = vst [vmem:[#allocation35_spill] sm:$0xff] %v5943_v14 }
 0x467   :  { %1844 = vmatmul.mubr.f32.gmra.mrb[104].mxu0 %v5916_v60  ;;  %v5937_v60 = vld [vmem:[#allocation2 + $0x178] sm:$0xff] }
 0x468   :  { %1848 = vmatprep.mubr.f32.mxu0 %v5919_v41  ;;  %4337 = vmatpush3.bf16.msra.mxu0 %v4334_v42  ;;  %v5934_v41 = vld [vmem:[#allocation2 + $0x160] sm:$0xff]  ;;  %6698 = vst [vmem:[#allocation33_spill] sm:$0xff] %v5937_v60  ;;  %v5949_v42 = vld [vmem:[#allocation2 + $0x198] sm:$0xff] }
 0x469   :  { %6697 = vst [vmem:[#allocation32_spill] sm:$0xff] %v5934_v41  ;;  %6702 = vst [vmem:[#allocation37_spill] sm:$0xff] %v5949_v42 }
 0x46b   :  { %1849 = vmatmul.mubr.f32.gmra.mrb[106].mxu0 %v5928_v58 }
 0x46c   :  { %1853 = vmatprep.mubr.f32.mxu0 %v5931_v24 }
 0x46f   :  { %1854 = vmatmul.mubr.f32.gmra.mrb[108].mxu0 %v5934_v41  ;;  %v5952_v41 = vld [vmem:[#allocation2 + $0x190] sm:$0xff] }
 0x470   :  { %1858 = vmatprep.mubr.f32.mxu0 %v5937_v60  ;;  %6703 = vst [vmem:[#allocation38_spill] sm:$0xff] %v5952_v41  ;;  %v5955_v60 = vld [vmem:[#allocation2 + $0x1a8] sm:$0xff] }
 0x471   :  { %6704 = vst [vmem:[#allocation39_spill] sm:$0xff] %v5955_v60 }
 0x473   :  { %1859 = vmatmul.mubr.f32.gmra.mrb[110].mxu0 %v5940_v40  ;;  %v5958_v40 = vld [vmem:[#allocation2 + $0x1a0] sm:$0xff] }
 0x474   :  { %1863 = vmatprep.mubr.f32.mxu0 %v5943_v14  ;;  %6705 = vst [vmem:[#allocation40_spill] sm:$0xff] %v5958_v40  ;;  %v5961_v14 = vld [vmem:[#allocation2 + $0x1b8] sm:$0xff] }
 0x475   :  { %6706 = vst [vmem:[#allocation41_spill] sm:$0xff] %v5961_v14 }
 0x477   :  { %1864 = vmatmul.mubr.f32.gmra.mrb[112].mxu0 %v5946_v50  ;;  %v5964_v50 = vld [vmem:[#allocation2 + $0x1b0] sm:$0xff] }
 0x478   :  { %1868 = vmatprep.mubr.f32.mxu0 %v5949_v42  ;;  %6707 = vst [vmem:[#allocation42_spill] sm:$0xff] %v5964_v50  ;;  %v5967_v42 = vld [vmem:[#allocation2 + $0x1c8] sm:$0xff] }
 0x479   :  { %6708 = vst [vmem:[#allocation43_spill] sm:$0xff] %v5967_v42 }
 0x47b   :  { %1869 = vmatmul.mubr.f32.gmra.mrb[114].mxu0 %v5952_v41  ;;  %v5970_v41 = vld [vmem:[#allocation2 + $0x1c0] sm:$0xff] }
 0x47c   :  { %1873 = vmatprep.mubr.f32.mxu0 %v5955_v60  ;;  %6709 = vst [vmem:[#allocation44_spill] sm:$0xff] %v5970_v41  ;;  %v5973_v60 = vld [vmem:[#allocation2 + $0x1d8] sm:$0xff] }
 0x47d   :  { %6710 = vst [vmem:[#allocation45_spill] sm:$0xff] %v5973_v60 }
 0x47f   :  { %1874 = vmatmul.mubr.f32.gmra.mrb[116].mxu0 %v5958_v40  ;;  %v5976_v40 = vld [vmem:[#allocation2 + $0x1d0] sm:$0xff] }
 0x480   :  { %1878 = vmatprep.mubr.f32.mxu0 %v5961_v14  ;;  %6711 = vst [vmem:[#allocation46_spill] sm:$0xff] %v5976_v40  ;;  %v5979_v14 = vld [vmem:[#allocation2 + $0x1e8] sm:$0xff] }
 0x481   :  { %6712 = vst [vmem:[#allocation47_spill] sm:$0xff] %v5979_v14 }
 0x483   :  { %1879 = vmatmul.mubr.f32.gmra.mrb[118].mxu0 %v5964_v50  ;;  %v5982_v50 = vld [vmem:[#allocation2 + $0x1e0] sm:$0xff] }
 0x484   :  { %1883 = vmatprep.mubr.f32.mxu0 %v5967_v42  ;;  %6713 = vst [vmem:[#allocation48_spill] sm:$0xff] %v5982_v50  ;;  %v5985_v42 = vld [vmem:[#allocation2 + $0x1f8] sm:$0xff] }
 0x485   :  { %6714 = vst [vmem:[#allocation49_spill] sm:$0xff] %v5985_v42 }
 0x487   :  { %1884 = vmatmul.mubr.f32.gmra.mrb[120].mxu0 %v5970_v41  ;;  %v5988_v41 = vld [vmem:[#allocation2 + $0x1f0] sm:$0xff] }
 0x488   :  { %1888 = vmatprep.mubr.f32.mxu0 %v5973_v60  ;;  %6715 = vst [vmem:[#allocation50_spill] sm:$0xff] %v5988_v41 }
 0x48b   :  { %1889 = vmatmul.mubr.f32.gmra.mrb[122].mxu0 %v5976_v40  ;;  %v1675_v40 = vld [vmem:[%s6360_s7] sm:$0xff] }
 0x48c   :  { %1893 = vmatprep.mubr.f32.mxu0 %v5979_v14  ;;  %v1676_v14 = vld [vmem:[%s6360_s7 + $0x8] sm:$0xff] }
 0x48d   :  { %v4338_v60 = vpack.c.bf16 %v1676_v14, %v1675_v40 }
 0x48f   :  { %1894 = vmatmul.mubr.f32.gmra.mrb[124].mxu0 %v5982_v50  ;;  %4339 = vmatprep.subr.bf16.mxu0 %v4338_v60 }
 0x490   :  { %1898 = vmatprep.mubr.f32.mxu0 %v5985_v42  ;;  %v1677_v42 = vld [vmem:[%s6360_s7 + $0x10] sm:$0xff] }
 0x493   :  { %1899 = vmatmul.mubr.f32.gmra.mrb[126].mxu0 %v5988_v41  ;;  %v1678_v41 = vld [vmem:[%s6360_s7 + $0x18] sm:$0xff] }
 0x494   :  { %v4342_v58 = vpack.c.bf16 %v1678_v41, %v1677_v42 }
 0x4ea   :  { %v1745_v50 = vpop.f32.mrb[64].mxu0 }
 0x4eb   :  { %v1747_v24 = vpop.f32.mrb[65].mxu0  ;;  %4015 = vmatprep.mubr.msk.f32.mxu0 %vm1908_vm1, %v1745_v50 }
 0x4ee   :  { %v1750_v16 = vpop.f32.mrb[66].mxu0 }
 0x4ef   :  { %v4347_v43 = vpack.c.bf16 %v1750_v16, %v1745_v50  ;;  %v1752_v31 = vpop.f32.mrb[67].mxu0  ;;  %4016 = vmatmul.mubr.msk.f32.vlgmr.msra.gmra.mrb[128].mxu0 %vm1908_vm1, %v1750_v16 }
 0x4f0   :  { %4341 = vmatpush3.bf16.msra.mxu0 %v4338_v60 }
 0x4f1   :  { %4348 = vmatpush1.bf16.msra.mxu1 %v4347_v43  ;;  %4343 = vmatprep.subr.bf16.mxu0 %v4342_v58 }
 0x4f2   :  { %v1755_v40 = vpop.f32.mrb[68].mxu0  ;;  %4349 = vmatprep.subr.bf16.mxu1 %v6584_v49 }
 0x4f3   :  { %v1757_v14 = vpop.f32.mrb[69].mxu0  ;;  %4018 = vmatprep.mubr.msk.f32.mxu0 %vm1908_vm1, %v1755_v40 }
 0x4f4   :  { %4345 = vmatpush3.bf16.msra.mxu0 %v4342_v58 }
 0x4f6   :  { %v1760_v19 = vpop.f32.mrb[70].mxu0 }
 0x4f7   :  { %v4350_v24 = vpack.c.bf16 %v1760_v19, %v1755_v40  ;;  %v1762_v53 = vpop.f32.mrb[71].mxu0  ;;  %4019 = vmatmul.mubr.msk.f32.gmra.mrb[130].mxu0 %vm1908_vm1, %v1760_v19 }
 0x4f9   :  { %4351 = vmatpush1.bf16.msra.mxu1 %v4350_v24 }
 0x4fa   :  { %v1765_v41 = vpop.f32.mrb[72].mxu0  ;;  %4352 = vmatprep.subr.bf16.mxu1 %v6584_v49 }
 0x4fb   :  { %v1767_v31 = vpop.f32.mrb[73].mxu0  ;;  %4021 = vmatprep.mubr.msk.f32.mxu0 %vm1908_vm1, %v1765_v41 }
 0x4fe   :  { %v1770_v60 = vpop.f32.mrb[74].mxu0 }
 0x4ff   :  { %v4353_v43 = vpack.c.bf16 %v1770_v60, %v1765_v41  ;;  %v1772_v16 = vpop.f32.mrb[75].mxu0  ;;  %4022 = vmatmul.mubr.msk.f32.gmra.mrb[132].mxu0 %vm1908_vm1, %v1770_v60 }
 0x501   :  { %4354 = vmatpush1.bf16.msra.mxu1 %v4353_v43 }
 0x502   :  { %v1775_v50 = vpop.f32.mrb[76].mxu0  ;;  %4355 = vmatprep.subr.bf16.mxu1 %v6584_v49 }
 0x503   :  { %v1777_v58 = vpop.f32.mrb[77].mxu0  ;;  %4024 = vmatprep.mubr.msk.f32.mxu0 %vm1908_vm1, %v1775_v50 }
 0x506   :  { %v1780_v19 = vpop.f32.mrb[78].mxu0 }
 0x507   :  { %v4356_v53 = vpack.c.bf16 %v1780_v19, %v1775_v50  ;;  %v1782_v42 = vpop.f32.mrb[79].mxu0  ;;  %4025 = vmatmul.mubr.msk.f32.gmra.mrb[134].mxu0 %vm1908_vm1, %v1780_v19 }
 0x509   :  { %4357 = vmatpush1.bf16.msra.mxu1 %v4356_v53 }
 0x50a   :  { %v1785_v40 = vpop.f32.mrb[80].mxu0  ;;  %4358 = vmatprep.subr.bf16.mxu1 %v6584_v49 }
 0x50b   :  { %v1787_v14 = vpop.f32.mrb[81].mxu0  ;;  %4027 = vmatprep.mubr.msk.f32.mxu0 %vm1908_vm1, %v1785_v40 }
 0x50e   :  { %v1790_v24 = vpop.f32.mrb[82].mxu0 }
 0x50f   :  { %v4359_v41 = vpack.c.bf16 %v1790_v24, %v1785_v40  ;;  %v1792_v31 = vpop.f32.mrb[83].mxu0  ;;  %4028 = vmatmul.mubr.msk.f32.gmra.mrb[136].mxu0 %vm1908_vm1, %v1790_v24 }
 0x511   :  { %4360 = vmatpush1.bf16.msra.mxu1 %v4359_v41 }
 0x512   :  { %v1795_v60 = vpop.f32.mrb[84].mxu0  ;;  %4361 = vmatprep.subr.bf16.mxu1 %v6584_v49 }
 0x513   :  { %v1797_v43 = vpop.f32.mrb[85].mxu0  ;;  %4030 = vmatprep.mubr.msk.f32.mxu0 %vm1908_vm1, %v1795_v60 }
 0x516   :  { %v1800_v16 = vpop.f32.mrb[86].mxu0 }
 0x517   :  { %v4362_v50 = vpack.c.bf16 %v1800_v16, %v1795_v60  ;;  %v1802_v58 = vpop.f32.mrb[87].mxu0  ;;  %4031 = vmatmul.mubr.msk.f32.gmra.mrb[138].mxu0 %vm1908_vm1, %v1800_v16 }
 0x519   :  { %4363 = vmatpush1.bf16.msra.mxu1 %v4362_v50 }
 0x51a   :  { %v1805_v19 = vpop.f32.mrb[88].mxu0  ;;  %4364 = vmatprep.subr.bf16.mxu1 %v6584_v49 }
 0x51b   :  { %v1807_v53 = vpop.f32.mrb[89].mxu0  ;;  %4033 = vmatprep.mubr.msk.f32.mxu0 %vm1908_vm1, %v1805_v19 }
 0x51e   :  { %v1810_v42 = vpop.f32.mrb[90].mxu0 }
 0x51f   :  { %v4365_v40 = vpack.c.bf16 %v1810_v42, %v1805_v19  ;;  %v1812_v14 = vpop.f32.mrb[91].mxu0  ;;  %4034 = vmatmul.mubr.msk.f32.gmra.mrb[140].mxu0 %vm1908_vm1, %v1810_v42 }
 0x521   :  { %4366 = vmatpush1.bf16.msra.mxu1 %v4365_v40 }
 0x522   :  { %v1815_v24 = vpop.f32.mrb[92].mxu0  ;;  %4367 = vmatprep.subr.bf16.mxu1 %v6584_v49 }
 0x523   :  { %v1817_v41 = vpop.f32.mrb[93].mxu0  ;;  %4036 = vmatprep.mubr.msk.f32.mxu0 %vm1908_vm1, %v1815_v24 }
 0x526   :  { %v1820_v31 = vpop.f32.mrb[94].mxu0 }
 0x527   :  { %v4368_v60 = vpack.c.bf16 %v1820_v31, %v1815_v24  ;;  %v1822_v43 = vpop.f32.mrb[95].mxu0  ;;  %4037 = vmatmul.mubr.msk.f32.gmra.mrb[142].mxu0 %vm1908_vm1, %v1820_v31 }
 0x529   :  { %4369 = vmatpush1.bf16.msra.mxu1 %v4368_v60 }
 0x52a   :  { %v1825_v16 = vpop.f32.mrb[96].mxu0  ;;  %4370 = vmatprep.subr.bf16.mxu1 %v6584_v49 }
 0x52b   :  { %v1827_v50 = vpop.f32.mrb[97].mxu0  ;;  %4039 = vmatprep.mubr.msk.f32.mxu0 %vm1908_vm1, %v1825_v16 }
 0x52e   :  { %v1830_v58 = vpop.f32.mrb[98].mxu0 }
 0x52f   :  { %v4371_v19 = vpack.c.bf16 %v1830_v58, %v1825_v16  ;;  %v1832_v53 = vpop.f32.mrb[99].mxu0  ;;  %4040 = vmatmul.mubr.msk.f32.gmra.mrb[144].mxu0 %vm1908_vm1, %v1830_v58 }
 0x531   :  { %4372 = vmatpush1.bf16.msra.mxu1 %v4371_v19 }
 0x532   :  { %v1835_v42 = vpop.f32.mrb[100].mxu0  ;;  %4373 = vmatprep.subr.bf16.mxu1 %v6584_v49 }
 0x533   :  { %v1837_v40 = vpop.f32.mrb[101].mxu0  ;;  %4042 = vmatprep.mubr.msk.f32.mxu0 %vm1908_vm1, %v1835_v42 }
 0x536   :  { %v1840_v14 = vpop.f32.mrb[102].mxu0 }
 0x537   :  { %v4374_v24 = vpack.c.bf16 %v1840_v14, %v1835_v42  ;;  %v1842_v41 = vpop.f32.mrb[103].mxu0  ;;  %4043 = vmatmul.mubr.msk.f32.gmra.mrb[146].mxu0 %vm1908_vm1, %v1840_v14 }
 0x539   :  { %4375 = vmatpush1.bf16.msra.mxu1 %v4374_v24 }
 0x53a   :  { %v1845_v31 = vpop.f32.mrb[104].mxu0  ;;  %4376 = vmatprep.subr.bf16.mxu1 %v6584_v49 }
 0x53b   :  { %v1847_v60 = vpop.f32.mrb[105].mxu0  ;;  %4045 = vmatprep.mubr.msk.f32.mxu0 %vm1908_vm1, %v1845_v31 }
 0x53e   :  { %v1850_v43 = vpop.f32.mrb[106].mxu0 }
 0x53f   :  { %v4377_v16 = vpack.c.bf16 %v1850_v43, %v1845_v31  ;;  %v1852_v50 = vpop.f32.mrb[107].mxu0  ;;  %4046 = vmatmul.mubr.msk.f32.gmra.mrb[148].mxu0 %vm1908_vm1, %v1850_v43 }
 0x541   :  { %4378 = vmatpush1.bf16.msra.mxu1 %v4377_v16 }
 0x542   :  { %v1855_v58 = vpop.f32.mrb[108].mxu0  ;;  %4379 = vmatprep.subr.bf16.mxu1 %v6584_v49 }
 0x543   :  { %v1857_v19 = vpop.f32.mrb[109].mxu0  ;;  %4048 = vmatprep.mubr.msk.f32.mxu0 %vm1908_vm1, %v1855_v58 }
 0x546   :  { %v1860_v53 = vpop.f32.mrb[110].mxu0 }
 0x547   :  { %v4380_v42 = vpack.c.bf16 %v1860_v53, %v1855_v58  ;;  %v1862_v40 = vpop.f32.mrb[111].mxu0  ;;  %4049 = vmatmul.mubr.msk.f32.gmra.mrb[150].mxu0 %vm1908_vm1, %v1860_v53 }
 0x549   :  { %4381 = vmatpush1.bf16.msra.mxu1 %v4380_v42 }
 0x54a   :  { %v1865_v14 = vpop.f32.mrb[112].mxu0  ;;  %4382 = vmatprep.subr.bf16.mxu1 %v6584_v49 }
 0x54b   :  { %v1867_v24 = vpop.f32.mrb[113].mxu0  ;;  %4051 = vmatprep.mubr.msk.f32.mxu0 %vm1908_vm1, %v1865_v14 }
 0x54e   :  { %v1870_v41 = vpop.f32.mrb[114].mxu0 }
 0x54f   :  { %v4383_v31 = vpack.c.bf16 %v1870_v41, %v1865_v14  ;;  %v1872_v60 = vpop.f32.mrb[115].mxu0  ;;  %4052 = vmatmul.mubr.msk.f32.gmra.mrb[152].mxu0 %vm1908_vm1, %v1870_v41 }
 0x551   :  { %4384 = vmatpush1.bf16.msra.mxu1 %v4383_v31 }
 0x552   :  { %v1875_v43 = vpop.f32.mrb[116].mxu0  ;;  %4385 = vmatprep.subr.bf16.mxu1 %v6584_v49 }
 0x553   :  { %v1877_v16 = vpop.f32.mrb[117].mxu0  ;;  %4054 = vmatprep.mubr.msk.f32.mxu0 %vm1908_vm1, %v1875_v43 }
 0x556   :  { %v1880_v50 = vpop.f32.mrb[118].mxu0 }
 0x557   :  { %v4386_v58 = vpack.c.bf16 %v1880_v50, %v1875_v43  ;;  %v1882_v19 = vpop.f32.mrb[119].mxu0  ;;  %4055 = vmatmul.mubr.msk.f32.gmra.mrb[154].mxu0 %vm1908_vm1, %v1880_v50  ;;  %v6716_v50 = vmax.f32 %v5587_v39, 0.0  ;;  %v6719_v39 = vmax.f32 %v5596_v52, 0.0  ;;  %v6723_v52 = vmax.f32 %v5622_v46, 0.0 }
 0x558   :  { %v6727_v46 = vmax.f32 %v5648_v47, 0.0  ;;  %v6731_v47 = vmax.f32 %v5674_v15, 0.0  ;;  %v6735_v15 = vmax.f32 %v5700_v45, 0.0 }
 0x559   :  { %4387 = vmatpush1.bf16.msra.mxu1 %v4386_v58  ;;  %v2776_v58 = vld [vmem:[%s6362_s9] sm:$0xff] }
 0x55a   :  { %v1885_v53 = vpop.f32.mrb[120].mxu0  ;;  %4388 = vmatprep.subr.bf16.mxu1 %v6584_v49 }
 0x55b   :  { %v1887_v42 = vpop.f32.mrb[121].mxu0  ;;  %4057 = vmatprep.mubr.msk.f32.mxu0 %vm1908_vm1, %v1885_v53 }
 0x55c   :  { %v6718_v42 = vmax.f32 %v5600_v56, 0.0  ;;  %v6722_v56 = vmax.f32 %v5626_v37, 0.0  ;;  %v6726_v37 = vmax.f32 %v5652_v44, 0.0  ;;  %v6730_v44 = vmax.f32 %v5678_v18, 0.0 }
 0x55d   :  { %v6734_v18 = vmax.f32 %v5704_v54, 0.0  ;;  %v6748_v54 = vld [vmem:[#allocation10_spill] sm:$0xff] }
 0x55e   :  { %v1890_v40 = vpop.f32.mrb[122].mxu0 }
 0x55f   :  { %v4389_v14 = vpack.c.bf16 %v1890_v40, %v1885_v53  ;;  %v1892_v24 = vpop.f32.mrb[123].mxu0  ;;  %4058 = vmatmul.mubr.msk.f32.gmra.mrb[156].mxu0 %vm1908_vm1, %v1890_v40  ;;  %v6717_v53 = vmax.f32 %v5584_v36, 0.0  ;;  %v6720_v40 = vmax.f32 %v5613_v25, 0.0  ;;  %v6721_v36 = vmax.f32 %v5609_v9, 0.0 }
 0x560   :  { %v6724_v25 = vmax.f32 %v5639_v59, 0.0  ;;  %v6725_v9 = vmax.f32 %v5635_v63, 0.0  ;;  %v6728_v59 = vmax.f32 %v5665_v7, 0.0  ;;  %v6729_v63 = vmax.f32 %v5661_v3, 0.0  ;;  %v6771_v24 = vld [vmem:[#allocation29_spill] sm:$0xff] }
 0x561   :  { %4390 = vmatpush1.bf16.msra.mxu1 %v4389_v14  ;;  %v6732_v7 = vmax.f32 %v5691_v29, 0.0  ;;  %v6733_v3 = vmax.f32 %v5687_v26, 0.0  ;;  %v6736_v29 = vmax.f32 %v5717_v13, 0.0  ;;  %v6742_v26 = vld [vmem:[#allocation76_spill] sm:$0xff] }
 0x562   :  { %v1895_v41 = vpop.f32.mrb[124].mxu0  ;;  %4391 = vmatprep.subr.bf16.mxu1 %v6584_v49  ;;  %v2777_v49 = vld [vmem:[%s6362_s9 + $0x8] sm:$0xff]  ;;  %v6754_v13 = vld [vmem:[#allocation12_spill] sm:$0xff] }
 0x563   :  { %v1897_v31 = vpop.f32.mrb[125].mxu0  ;;  %4060 = vmatprep.mubr.msk.f32.mxu0 %vm1908_vm1, %v1895_v41  ;;  %v4394_v19 = vpack.c.bf16 %v2777_v49, %v2776_v58  ;;  %v6770_v14 = vld [vmem:[#allocation28_spill] sm:$0xff]  ;;  %v6775_v58 = vld [vmem:[#allocation33_spill] sm:$0xff]  ;;  %v6776_v49 = vld [vmem:[#allocation34_spill] sm:$0xff] }
 0x564   :  { %v2779_v31 = vld [vmem:[%s6362_s9 + $0x18] sm:$0xff] }
 0x565   :  { %4395 = vmatprep.subr.bf16.mxu0 %v4394_v19 }
 0x566   :  { %v1900_v60 = vpop.f32.mrb[126].mxu0 }
 0x567   :  { %v4392_v43 = vpack.c.bf16 %v1900_v60, %v1895_v41  ;;  %v1902_v16 = vpop.f32.mrb[127].mxu0  ;;  %4061 = vmatmul.mubr.msk.f32.gmra.mrb[158].mxu0 %vm1908_vm1, %v1900_v60  ;;  %v2778_v41 = vld [vmem:[%s6362_s9 + $0x10] sm:$0xff] }
 0x568   :  { %4071 = vmatprep.mubr.msk.f32.mxu0 %vm1908_vm1, %v6716_v50  ;;  %v4398_v60 = vpack.c.bf16 %v2779_v31, %v2778_v41  ;;  %v6773_v16 = vld [vmem:[#allocation31_spill] sm:$0xff]  ;;  %v6774_v50 = vld [vmem:[#allocation32_spill] sm:$0xff] }
 0x569   :  { %4393 = vmatpush1.bf16.msra.mxu1 %v4392_v43  ;;  %v6772_v43 = vld [vmem:[#allocation30_spill] sm:$0xff] }
 0x56b   :  { %4072 = vmatmul.mubr.msk.f32.vlgmr.msra.gmra.mrb[128].mxu0 %vm1908_vm1, %v6717_v53  ;;  %v6778_v53 = vld [vmem:[#allocation36_spill] sm:$0xff] }
 0x56c   :  { %4074 = vmatprep.mubr.msk.f32.mxu0 %vm1908_vm1, %v6718_v42  ;;  %2616 = vmatmul.mubr.f32.vlgmr.msra.gmra.mrb[96].mxu1 %v5796_v17  ;;  %v6765_v17 = vld [vmem:[#allocation23_spill] sm:$0xff]  ;;  %v6779_v42 = vld [vmem:[#allocation37_spill] sm:$0xff] }
 0x56d   :  { %2620 = vmatprep.mubr.f32.mxu1 %v5799_v35  ;;  %4397 = vmatpush3.bf16.msra.mxu0 %v4394_v19  ;;  %v6763_v35 = vld [vmem:[#allocation21_spill] sm:$0xff]  ;;  %v6777_v19 = vld [vmem:[#allocation35_spill] sm:$0xff] }
 0x56e   :  { %4399 = vmatprep.subr.bf16.mxu0 %v4398_v60 }
 0x56f   :  { %4075 = vmatmul.mubr.msk.f32.gmra.mrb[130].mxu0 %vm1908_vm1, %v6719_v39  ;;  %v6780_v39 = vld [vmem:[#allocation38_spill] sm:$0xff] }
 0x570   :  { %4077 = vmatprep.mubr.msk.f32.mxu0 %vm1908_vm1, %v6720_v40  ;;  %2621 = vmatmul.mubr.f32.gmra.mrb[98].mxu1 %v5802_v38  ;;  %v6764_v38 = vld [vmem:[#allocation22_spill] sm:$0xff]  ;;  %v6781_v40 = vld [vmem:[#allocation39_spill] sm:$0xff] }
 0x571   :  { %2625 = vmatprep.mubr.f32.mxu1 %v5805_v5  ;;  %4401 = vmatpush3.bf16.msra.mxu0 %v4398_v60 }
 0x573   :  { %4078 = vmatmul.mubr.msk.f32.gmra.mrb[132].mxu0 %vm1908_vm1, %v6721_v36  ;;  %v6782_v36 = vld [vmem:[#allocation40_spill] sm:$0xff] }
 0x574   :  { %4080 = vmatprep.mubr.msk.f32.mxu0 %vm1908_vm1, %v6722_v56  ;;  %2626 = vmatmul.mubr.f32.gmra.mrb[100].mxu1 %v5808_v28  ;;  %v6766_v28 = vld [vmem:[#allocation24_spill] sm:$0xff]  ;;  %v6783_v56 = vld [vmem:[#allocation41_spill] sm:$0xff] }
 0x575   :  { %2630 = vmatprep.mubr.f32.mxu1 %v5811_v51  ;;  %v6767_v51 = vld [vmem:[#allocation25_spill] sm:$0xff] }
 0x577   :  { %4081 = vmatmul.mubr.msk.f32.gmra.mrb[134].mxu0 %vm1908_vm1, %v6723_v52  ;;  %v6784_v52 = vld [vmem:[#allocation42_spill] sm:$0xff] }
 0x578   :  { %4083 = vmatprep.mubr.msk.f32.mxu0 %vm1908_vm1, %v6724_v25  ;;  %2631 = vmatmul.mubr.f32.gmra.mrb[102].mxu1 %v5814_v1  ;;  %v6768_v1 = vld [vmem:[#allocation26_spill] sm:$0xff]  ;;  %v6785_v25 = vld [vmem:[#allocation43_spill] sm:$0xff] }
 0x579   :  { %2635 = vmatprep.mubr.f32.mxu1 %v5817_v33  ;;  %v6769_v33 = vld [vmem:[#allocation27_spill] sm:$0xff] }
 0x57b   :  { %4084 = vmatmul.mubr.msk.f32.gmra.mrb[136].mxu0 %vm1908_vm1, %v6725_v9  ;;  %v6786_v9 = vld [vmem:[#allocation44_spill] sm:$0xff] }
 0x57c   :  { %4086 = vmatprep.mubr.msk.f32.mxu0 %vm1908_vm1, %v6726_v37  ;;  %2636 = vmatmul.mubr.f32.gmra.mrb[104].mxu1 %v5820_v11  ;;  %v6760_v11 = vld [vmem:[#allocation18_spill] sm:$0xff]  ;;  %v6787_v37 = vld [vmem:[#allocation45_spill] sm:$0xff] }
 0x57d   :  { %2640 = vmatprep.mubr.f32.mxu1 %v5823_v6  ;;  %v6755_v6 = vmax.f32 %v6754_v13, 0.0 }
 0x57f   :  { %4087 = vmatmul.mubr.msk.f32.gmra.mrb[138].mxu0 %vm1908_vm1, %v6727_v46  ;;  %v6788_v46 = vld [vmem:[#allocation46_spill] sm:$0xff] }
 0x580   :  { %4089 = vmatprep.mubr.msk.f32.mxu0 %vm1908_vm1, %v6728_v59  ;;  %2641 = vmatmul.mubr.f32.gmra.mrb[106].mxu1 %v5826_v61  ;;  %v6756_v61 = vld [vmem:[#allocation16_spill] sm:$0xff]  ;;  %v6789_v59 = vld [vmem:[#allocation47_spill] sm:$0xff] }
 0x581   :  { %2645 = vmatprep.mubr.f32.mxu1 %v5829_v62  ;;  %v6751_v62 = vld [vmem:[#allocation15_spill] sm:$0xff] }
 0x583   :  { %4090 = vmatmul.mubr.msk.f32.gmra.mrb[140].mxu0 %vm1908_vm1, %v6729_v63  ;;  %v6790_v63 = vld [vmem:[#allocation48_spill] sm:$0xff] }
 0x584   :  { %4092 = vmatprep.mubr.msk.f32.mxu0 %vm1908_vm1, %v6730_v44  ;;  %2646 = vmatmul.mubr.f32.gmra.mrb[108].mxu1 %v5832_v4  ;;  %v6752_v4 = vld [vmem:[#allocation9_spill] sm:$0xff] }
 0x585   :  { %2650 = vmatprep.mubr.f32.mxu1 %v5835_v30  ;;  %v6745_v30 = vld [vmem:[#allocation13_spill] sm:$0xff] }
 0x586   :  { %v6791_v44 = vld [vmem:[#allocation49_spill] sm:$0xff] }
 0x587   :  { %4093 = vmatmul.mubr.msk.f32.gmra.mrb[142].mxu0 %vm1908_vm1, %v6731_v47  ;;  %v6792_v47 = vld [vmem:[#allocation50_spill] sm:$0xff] }
 0x588   :  { %4095 = vmatprep.mubr.msk.f32.mxu0 %vm1908_vm1, %v6732_v7  ;;  %2651 = vmatmul.mubr.f32.gmra.mrb[110].mxu1 %v5838_v32  ;;  %v6746_v32 = vld [vmem:[#allocation77_spill] sm:$0xff] }
 0x589   :  { %2655 = vmatprep.mubr.f32.mxu1 %v5841_v20  ;;  %v6737_v20 = vmax.f32 %v5713_v34, 0.0  ;;  %v6747_v45 = vmax.f32 %v6746_v32, 0.0  ;;  %v6753_v34 = vmax.f32 %v6752_v4, 0.0 }
 0x58b   :  { %4096 = vmatmul.mubr.msk.f32.gmra.mrb[144].mxu0 %vm1908_vm1, %v6733_v3 }
 0x58c   :  { %4098 = vmatprep.mubr.msk.f32.mxu0 %vm1908_vm1, %v6734_v18  ;;  %2656 = vmatmul.mubr.f32.gmra.mrb[112].mxu1 %v5844_v21  ;;  %v6738_v21 = vmax.f32 %v5730_v2, 0.0  ;;  %v6758_v2 = vld [vmem:[#allocation11_spill] sm:$0xff] }
 0x58d   :  { %2660 = vmatprep.mubr.f32.mxu1 %v5847_v8  ;;  %v6739_v8 = vmax.f32 %v5726_v12, 0.0  ;;  %v6757_v12 = vld [vmem:[#allocation17_spill] sm:$0xff]  ;;  %v6759_v5 = vmax.f32 %v6758_v2, 0.0 }
 0x58f   :  { %4099 = vmatmul.mubr.msk.f32.gmra.mrb[146].mxu0 %vm1908_vm1, %v6735_v15 }
 0x590   :  { %4101 = vmatprep.mubr.msk.f32.mxu0 %vm1908_vm1, %v6736_v29  ;;  %2661 = vmatmul.mubr.f32.gmra.mrb[114].mxu1 %v5850_v10  ;;  %v6740_v10 = vmax.f32 %v5743_v27, 0.0  ;;  %v6762_v27 = vld [vmem:[#allocation20_spill] sm:$0xff] }
 0x591   :  { %2665 = vmatprep.mubr.f32.mxu1 %v5853_v48  ;;  %v6741_v48 = vmax.f32 %v5739_v23, 0.0  ;;  %v6761_v23 = vld [vmem:[#allocation19_spill] sm:$0xff] }
 0x593   :  { %4102 = vmatmul.mubr.msk.f32.gmra.mrb[148].mxu0 %vm1908_vm1, %v6737_v20 }
 0x594   :  { %4104 = vmatprep.mubr.msk.f32.mxu0 %vm1908_vm1, %v6738_v21  ;;  %2666 = vmatmul.mubr.f32.gmra.mrb[116].mxu1 %v5856_v0  ;;  %v6743_v0 = vmax.f32 %v6742_v26, 0.0 }
 0x595   :  { %2670 = vmatprep.mubr.f32.mxu1 %v5859_v57  ;;  %v6744_v57 = vld [vmem:[#allocation8_spill] sm:$0xff] }
 0x597   :  { %4105 = vmatmul.mubr.msk.f32.gmra.mrb[150].mxu0 %vm1908_vm1, %v6739_v8 }
 0x598   :  { %4107 = vmatprep.mubr.msk.f32.mxu0 %vm1908_vm1, %v6740_v10  ;;  %2671 = vmatmul.mubr.f32.gmra.mrb[118].mxu1 %v5862_v55  ;;  %v6749_v55 = vmax.f32 %v6748_v54, 0.0 }
 0x599   :  { %2675 = vmatprep.mubr.f32.mxu1 %v5865_v22  ;;  %v6750_v22 = vld [vmem:[#allocation14_spill] sm:$0xff] }
 0x59b   :  { %4108 = vmatmul.mubr.msk.f32.gmra.mrb[152].mxu0 %vm1908_vm1, %v6741_v48 }
 0x59c   :  { %4110 = vmatprep.mubr.msk.f32.mxu0 %vm1908_vm1, %v6743_v0  ;;  %2676 = vmatmul.mubr.f32.gmra.mrb[120].mxu1 %v6744_v57 }
 0x59d   :  { %2680 = vmatprep.mubr.f32.mxu1 %v6745_v30 }
 0x59f   :  { %4111 = vmatmul.mubr.msk.f32.gmra.mrb[154].mxu0 %vm1908_vm1, %v6747_v45 }
 0x5a0   :  { %4113 = vmatprep.mubr.msk.f32.mxu0 %vm1908_vm1, %v6749_v55  ;;  %2681 = vmatmul.mubr.f32.gmra.mrb[122].mxu1 %v6750_v22 }
 0x5a1   :  { %2685 = vmatprep.mubr.f32.mxu1 %v6751_v62 }
 0x5a3   :  { %4114 = vmatmul.mubr.msk.f32.gmra.mrb[156].mxu0 %vm1908_vm1, %v6753_v34 }
 0x5a4   :  { %4116 = vmatprep.mubr.msk.f32.mxu0 %vm1908_vm1, %v6755_v6  ;;  %2686 = vmatmul.mubr.f32.gmra.mrb[124].mxu1 %v6756_v61 }
 0x5a5   :  { %2690 = vmatprep.mubr.f32.mxu1 %v6757_v12 }
 0x5a7   :  { %4117 = vmatmul.mubr.msk.f32.gmra.mrb[158].mxu0 %vm1908_vm1, %v6759_v5 }
 0x5a8   :  { %2691 = vmatmul.mubr.f32.gmra.mrb[126].mxu1 %v6760_v11 }
 0x5a9   :  { %2695 = vmatprep.mubr.f32.mxu1 %v6761_v23 }
 0x5ac   :  { %2696 = vmatmul.mubr.f32.gmra.mrb[128].mxu1 %v6762_v27 }
 0x5ad   :  { %2700 = vmatprep.mubr.f32.mxu1 %v6763_v35 }
 0x5b0   :  { %2701 = vmatmul.mubr.f32.gmra.mrb[130].mxu1 %v6764_v38 }
 0x5b1   :  { %2705 = vmatprep.mubr.f32.mxu1 %v6765_v17 }
 0x5b4   :  { %2706 = vmatmul.mubr.f32.gmra.mrb[132].mxu1 %v6766_v28 }
 0x5b5   :  { %2710 = vmatprep.mubr.f32.mxu1 %v6767_v51 }
 0x5b8   :  { %2711 = vmatmul.mubr.f32.gmra.mrb[134].mxu1 %v6768_v1 }
 0x5b9   :  { %2715 = vmatprep.mubr.f32.mxu1 %v6769_v33 }
 0x5bc   :  { %2716 = vmatmul.mubr.f32.gmra.mrb[136].mxu1 %v6770_v14 }
 0x5bd   :  { %2720 = vmatprep.mubr.f32.mxu1 %v6771_v24 }
 0x5c0   :  { %2721 = vmatmul.mubr.f32.gmra.mrb[138].mxu1 %v6772_v43 }
 0x5c1   :  { %2725 = vmatprep.mubr.f32.mxu1 %v6773_v16 }
 0x5c4   :  { %2726 = vmatmul.mubr.f32.gmra.mrb[140].mxu1 %v6774_v50 }
 0x5c5   :  { %2730 = vmatprep.mubr.f32.mxu1 %v6775_v58 }
 0x5c8   :  { %2731 = vmatmul.mubr.f32.gmra.mrb[142].mxu1 %v6776_v49 }
 0x5c9   :  { %2735 = vmatprep.mubr.f32.mxu1 %v6777_v19 }
 0x5cc   :  { %2736 = vmatmul.mubr.f32.gmra.mrb[144].mxu1 %v6778_v53 }
 0x5cd   :  { %2740 = vmatprep.mubr.f32.mxu1 %v6779_v42 }
 0x5d0   :  { %2741 = vmatmul.mubr.f32.gmra.mrb[146].mxu1 %v6780_v39 }
 0x5d1   :  { %2745 = vmatprep.mubr.f32.mxu1 %v6781_v40 }
 0x5d4   :  { %2746 = vmatmul.mubr.f32.gmra.mrb[148].mxu1 %v6782_v36 }
 0x5d5   :  { %2750 = vmatprep.mubr.f32.mxu1 %v6783_v56 }
 0x5d8   :  { %2751 = vmatmul.mubr.f32.gmra.mrb[150].mxu1 %v6784_v52 }
 0x5d9   :  { %2755 = vmatprep.mubr.f32.mxu1 %v6785_v25 }
 0x5dc   :  { %2756 = vmatmul.mubr.f32.gmra.mrb[152].mxu1 %v6786_v9 }
 0x5dd   :  { %2760 = vmatprep.mubr.f32.mxu1 %v6787_v37 }
 0x5e0   :  { %2761 = vmatmul.mubr.f32.gmra.mrb[154].mxu1 %v6788_v46 }
 0x5e1   :  { %2765 = vmatprep.mubr.f32.mxu1 %v6789_v59 }
 0x5e4   :  { %2766 = vmatmul.mubr.f32.gmra.mrb[156].mxu1 %v6790_v63 }
 0x5e5   :  { %2770 = vmatprep.mubr.f32.mxu1 %v6791_v44 }
 0x5e8   :  { %2771 = vmatmul.mubr.f32.gmra.mrb[158].mxu1 %v6792_v47 }
 0x63f   :  { %v2617_v7 = vpop.f32.mrb[96].mxu1 }
 0x640   :  { %v2619_v3 = vpop.f32.mrb[97].mxu1  ;;  %4127 = vmatprep.mubr.msk.f32.mxu0 %vm1908_vm1, %v2617_v7  ;;  %v6256_v7 = vld [vmem:[%s6363_s10] ss:$0 sm:$0xff] }
 0x643   :  { %v2622_v18 = vpop.f32.mrb[98].mxu1 }
 0x644   :  { %v2624_v15 = vpop.f32.mrb[99].mxu1  ;;  %4128 = vmatmul.mubr.msk.f32.vlgmr.msra.gmra.mrb[128].mxu0 %vm1908_vm1, %v2622_v18 }
 0x647   :  { %v2627_v29 = vpop.f32.mrb[100].mxu1 }
 0x648   :  { %v2629_v20 = vpop.f32.mrb[101].mxu1  ;;  %4130 = vmatprep.mubr.msk.f32.mxu0 %vm1908_vm1, %v2627_v29  ;;  %v3205_v29 = vld [vmem:[%s6355_s2 + $0x8] sm:$0xff] }
 0x649   :  { %3272 = vmatprep.mubr.f32.mxu1 %v3205_v29 }
 0x64b   :  { %v2632_v21 = vpop.f32.mrb[102].mxu1 }
 0x64c   :  { %v2634_v8 = vpop.f32.mrb[103].mxu1  ;;  %4131 = vmatmul.mubr.msk.f32.gmra.mrb[130].mxu0 %vm1908_vm1, %v2632_v21 }
 0x64f   :  { %v2637_v10 = vpop.f32.mrb[104].mxu1 }
 0x650   :  { %v2639_v48 = vpop.f32.mrb[105].mxu1  ;;  %4133 = vmatprep.mubr.msk.f32.mxu0 %vm1908_vm1, %v2637_v10 }
 0x653   :  { %v2642_v26 = vpop.f32.mrb[106].mxu1 }
 0x654   :  { %v2644_v0 = vpop.f32.mrb[107].mxu1  ;;  %4134 = vmatmul.mubr.msk.f32.gmra.mrb[132].mxu0 %vm1908_vm1, %v2642_v26 }
 0x657   :  { %v2647_v57 = vpop.f32.mrb[108].mxu1 }
 0x658   :  { %v2649_v30 = vpop.f32.mrb[109].mxu1  ;;  %4136 = vmatprep.mubr.msk.f32.mxu0 %vm1908_vm1, %v2647_v57 }
 0x65b   :  { %v2652_v32 = vpop.f32.mrb[110].mxu1 }
 0x65c   :  { %v2654_v45 = vpop.f32.mrb[111].mxu1  ;;  %4137 = vmatmul.mubr.msk.f32.gmra.mrb[134].mxu0 %vm1908_vm1, %v2652_v32 }
 0x65f   :  { %v2657_v54 = vpop.f32.mrb[112].mxu1 }
 0x660   :  { %v2659_v55 = vpop.f32.mrb[113].mxu1  ;;  %4139 = vmatprep.mubr.msk.f32.mxu0 %vm1908_vm1, %v2657_v54 }
 0x663   :  { %v2662_v22 = vpop.f32.mrb[114].mxu1 }
 0x664   :  { %v2664_v62 = vpop.f32.mrb[115].mxu1  ;;  %4140 = vmatmul.mubr.msk.f32.gmra.mrb[136].mxu0 %vm1908_vm1, %v2662_v22 }
 0x667   :  { %v2667_v4 = vpop.f32.mrb[116].mxu1 }
 0x668   :  { %v2669_v34 = vpop.f32.mrb[117].mxu1  ;;  %4142 = vmatprep.mubr.msk.f32.mxu0 %vm1908_vm1, %v2667_v4 }
 0x66b   :  { %v2672_v13 = vpop.f32.mrb[118].mxu1 }
 0x66c   :  { %v2674_v6 = vpop.f32.mrb[119].mxu1  ;;  %4143 = vmatmul.mubr.msk.f32.gmra.mrb[138].mxu0 %vm1908_vm1, %v2672_v13 }
 0x66f   :  { %v2677_v61 = vpop.f32.mrb[120].mxu1 }
 0x670   :  { %v2679_v12 = vpop.f32.mrb[121].mxu1  ;;  %4145 = vmatprep.mubr.msk.f32.mxu0 %vm1908_vm1, %v2677_v61 }
 0x673   :  { %v2682_v2 = vpop.f32.mrb[122].mxu1 }
 0x674   :  { %v2684_v5 = vpop.f32.mrb[123].mxu1  ;;  %4146 = vmatmul.mubr.msk.f32.gmra.mrb[140].mxu0 %vm1908_vm1, %v2682_v2 }
 0x677   :  { %v2687_v11 = vpop.f32.mrb[124].mxu1 }
 0x678   :  { %v2689_v23 = vpop.f32.mrb[125].mxu1  ;;  %4148 = vmatprep.mubr.msk.f32.mxu0 %vm1908_vm1, %v2687_v11 }
 0x67b   :  { %v2692_v27 = vpop.f32.mrb[126].mxu1 }
 0x67c   :  { %v2694_v35 = vpop.f32.mrb[127].mxu1  ;;  %4149 = vmatmul.mubr.msk.f32.gmra.mrb[142].mxu0 %vm1908_vm1, %v2692_v27 }
 0x67f   :  { %v2697_v38 = vpop.f32.mrb[128].mxu1 }
 0x680   :  { %v2699_v17 = vpop.f32.mrb[129].mxu1  ;;  %4151 = vmatprep.mubr.msk.f32.mxu0 %vm1908_vm1, %v2697_v38 }
 0x683   :  { %v2702_v28 = vpop.f32.mrb[130].mxu1 }
 0x684   :  { %v2704_v51 = vpop.f32.mrb[131].mxu1  ;;  %4152 = vmatmul.mubr.msk.f32.gmra.mrb[144].mxu0 %vm1908_vm1, %v2702_v28 }
 0x687   :  { %v2707_v1 = vpop.f32.mrb[132].mxu1 }
 0x688   :  { %v2709_v33 = vpop.f32.mrb[133].mxu1  ;;  %4154 = vmatprep.mubr.msk.f32.mxu0 %vm1908_vm1, %v2707_v1 }
 0x68b   :  { %v2712_v14 = vpop.f32.mrb[134].mxu1 }
 0x68c   :  { %4155 = vmatmul.mubr.msk.f32.gmra.mrb[146].mxu0 %vm1908_vm1, %v2712_v14  ;;  %v2714_v24 = vpop.f32.mrb[135].mxu1 }
 0x68f   :  { %v2717_v41 = vpop.f32.mrb[136].mxu1 }
 0x690   :  { %v2719_v31 = vpop.f32.mrb[137].mxu1  ;;  %4157 = vmatprep.mubr.msk.f32.mxu0 %vm1908_vm1, %v2717_v41 }
 0x693   :  { %v2722_v60 = vpop.f32.mrb[138].mxu1 }
 0x694   :  { %4158 = vmatmul.mubr.msk.f32.gmra.mrb[148].mxu0 %vm1908_vm1, %v2722_v60  ;;  %v2724_v43 = vpop.f32.mrb[139].mxu1 }
 0x697   :  { %v2727_v16 = vpop.f32.mrb[140].mxu1 }
 0x698   :  { %v2729_v50 = vpop.f32.mrb[141].mxu1  ;;  %4160 = vmatprep.mubr.msk.f32.mxu0 %vm1908_vm1, %v2727_v16 }
 0x69b   :  { %v2732_v58 = vpop.f32.mrb[142].mxu1 }
 0x69c   :  { %4161 = vmatmul.mubr.msk.f32.gmra.mrb[150].mxu0 %vm1908_vm1, %v2732_v58  ;;  %v2734_v49 = vpop.f32.mrb[143].mxu1 }
 0x69f   :  { %v2737_v19 = vpop.f32.mrb[144].mxu1 }
 0x6a0   :  { %v2739_v53 = vpop.f32.mrb[145].mxu1  ;;  %4163 = vmatprep.mubr.msk.f32.mxu0 %vm1908_vm1, %v2737_v19 }
 0x6a3   :  { %v2742_v42 = vpop.f32.mrb[146].mxu1 }
 0x6a4   :  { %4164 = vmatmul.mubr.msk.f32.gmra.mrb[152].mxu0 %vm1908_vm1, %v2742_v42  ;;  %v2744_v39 = vpop.f32.mrb[147].mxu1 }
 0x6a7   :  { %v2747_v40 = vpop.f32.mrb[148].mxu1 }
 0x6a8   :  { %v2749_v36 = vpop.f32.mrb[149].mxu1  ;;  %4166 = vmatprep.mubr.msk.f32.mxu0 %vm1908_vm1, %v2747_v40 }
 0x6ab   :  { %v2752_v56 = vpop.f32.mrb[150].mxu1 }
 0x6ac   :  { %4167 = vmatmul.mubr.msk.f32.gmra.mrb[154].mxu0 %vm1908_vm1, %v2752_v56  ;;  %v2754_v52 = vpop.f32.mrb[151].mxu1 }
 0x6af   :  { %v2757_v25 = vpop.f32.mrb[152].mxu1 }
 0x6b0   :  { %v2759_v9 = vpop.f32.mrb[153].mxu1  ;;  %4169 = vmatprep.mubr.msk.f32.mxu0 %vm1908_vm1, %v2757_v25 }
 0x6b3   :  { %v2762_v37 = vpop.f32.mrb[154].mxu1 }
 0x6b4   :  { %4170 = vmatmul.mubr.msk.f32.gmra.mrb[156].mxu0 %vm1908_vm1, %v2762_v37  ;;  %v2764_v46 = vpop.f32.mrb[155].mxu1 }
 0x6b7   :  { %v2767_v59 = vpop.f32.mrb[156].mxu1 }
 0x6b8   :  { %v2769_v63 = vpop.f32.mrb[157].mxu1  ;;  %4172 = vmatprep.mubr.msk.f32.mxu0 %vm1908_vm1, %v2767_v59 }
 0x6bb   :  { %v2772_v44 = vpop.f32.mrb[158].mxu1 }
 0x6bc   :  { %4173 = vmatmul.mubr.msk.f32.gmra.mrb[158].mxu0 %vm1908_vm1, %v2772_v44  ;;  %v2774_v47 = vpop.f32.mrb[159].mxu1 }
 0x717   :  { %v4129_v3 = vpop.f32.mrb[128].mxu0 }
 0x718   :  { %v3141_v18 = vadd.f32 %v4129_v3, %v6256_v7  ;;  %v2942_v15 = vpop.f32.mrb[129].mxu0 }
 0x719   :  { %v3140_v20 = vadd.f32 %v6256_v7, %v2942_v15 }
 0x71a   :  { %v3173_v21 = vmax.f32 %v3141_v18, 0.0 }
 0x71b   :  { %v3172_v8 = vmax.f32 %v3140_v20, 0.0 }
 0x71d   :  { %v4404_v10 = vpack.c.bf16 %v3173_v21, %v3172_v8 }
 0x71f   :  { %v4132_v48 = vpop.f32.mrb[130].mxu0 }
 0x720   :  { %v3143_v26 = vadd.f32 %v4132_v48, %v6256_v7  ;;  %v2952_v0 = vpop.f32.mrb[131].mxu0 }
 0x721   :  { %v3142_v57 = vadd.f32 %v6256_v7, %v2952_v0 }
 0x722   :  { %v3175_v30 = vmax.f32 %v3143_v26, 0.0 }
 0x723   :  { %v3174_v32 = vmax.f32 %v3142_v57, 0.0 }
 0x725   :  { %v4408_v45 = vpack.c.bf16 %v3175_v30, %v3174_v32 }
 0x727   :  { %v4135_v54 = vpop.f32.mrb[132].mxu0 }
 0x728   :  { %v3145_v55 = vadd.f32 %v4135_v54, %v6256_v7  ;;  %v2962_v22 = vpop.f32.mrb[133].mxu0 }
 0x729   :  { %v3144_v62 = vadd.f32 %v6256_v7, %v2962_v22 }
 0x72a   :  { %v3177_v4 = vmax.f32 %v3145_v55, 0.0 }
 0x72b   :  { %v3176_v34 = vmax.f32 %v3144_v62, 0.0 }
 0x72d   :  { %v6267_v13 = vpack.c.bf16 %v3177_v4, %v3176_v34 }
 0x72f   :  { %v4138_v6 = vpop.f32.mrb[134].mxu0 }
 0x730   :  { %v3147_v61 = vadd.f32 %v4138_v6, %v6256_v7  ;;  %v2972_v12 = vpop.f32.mrb[135].mxu0 }
 0x731   :  { %v3146_v2 = vadd.f32 %v6256_v7, %v2972_v12 }
 0x732   :  { %v3179_v5 = vmax.f32 %v3147_v61, 0.0 }
 0x733   :  { %v3178_v11 = vmax.f32 %v3146_v2, 0.0 }
 0x735   :  { %v6271_v23 = vpack.c.bf16 %v3179_v5, %v3178_v11 }
 0x737   :  { %v4141_v27 = vpop.f32.mrb[136].mxu0 }
 0x738   :  { %v3149_v35 = vadd.f32 %v4141_v27, %v6256_v7  ;;  %v2982_v38 = vpop.f32.mrb[137].mxu0 }
 0x739   :  { %v3148_v17 = vadd.f32 %v6256_v7, %v2982_v38 }
 0x73a   :  { %v3181_v28 = vmax.f32 %v3149_v35, 0.0 }
 0x73b   :  { %v3180_v51 = vmax.f32 %v3148_v17, 0.0 }
 0x73d   :  { %v6275_v1 = vpack.c.bf16 %v3181_v28, %v3180_v51 }
 0x73f   :  { %v4144_v33 = vpop.f32.mrb[138].mxu0 }
 0x740   :  { %v3151_v14 = vadd.f32 %v4144_v33, %v6256_v7  ;;  %v2992_v24 = vpop.f32.mrb[139].mxu0 }
 0x741   :  { %v3150_v41 = vadd.f32 %v6256_v7, %v2992_v24 }
 0x742   :  { %v3183_v31 = vmax.f32 %v3151_v14, 0.0 }
 0x743   :  { %v3182_v60 = vmax.f32 %v3150_v41, 0.0 }
 0x745   :  { %v6279_v43 = vpack.c.bf16 %v3183_v31, %v3182_v60 }
 0x747   :  { %v4147_v16 = vpop.f32.mrb[140].mxu0 }
 0x748   :  { %v3153_v50 = vadd.f32 %v4147_v16, %v6256_v7  ;;  %v3002_v58 = vpop.f32.mrb[141].mxu0 }
 0x749   :  { %v3152_v49 = vadd.f32 %v6256_v7, %v3002_v58 }
 0x74a   :  { %v3185_v19 = vmax.f32 %v3153_v50, 0.0 }
 0x74b   :  { %v3184_v53 = vmax.f32 %v3152_v49, 0.0 }
 0x74d   :  { %v6283_v42 = vpack.c.bf16 %v3185_v19, %v3184_v53 }
 0x74f   :  { %v4150_v39 = vpop.f32.mrb[142].mxu0 }
 0x750   :  { %v3155_v40 = vadd.f32 %v4150_v39, %v6256_v7  ;;  %v3012_v36 = vpop.f32.mrb[143].mxu0  ;;  %v3283_v39 = vld [vmem:[%s6364_s11] sm:$0xff] }
 0x751   :  { %v3154_v56 = vadd.f32 %v6256_v7, %v3012_v36 }
 0x752   :  { %v3187_v52 = vmax.f32 %v3155_v40, 0.0 }
 0x753   :  { %v3186_v25 = vmax.f32 %v3154_v56, 0.0 }
 0x755   :  { %v6287_v9 = vpack.c.bf16 %v3187_v52, %v3186_v25  ;;  %v3206_v52 = vld [vmem:[%s6355_s2 + $0x10] sm:$0xff] }
 0x756   :  { %v3285_v25 = vld [vmem:[%s6364_s11 + $0x10] sm:$0xff] }
 0x757   :  { %v4153_v37 = vpop.f32.mrb[144].mxu0 }
 0x758   :  { %v3157_v46 = vadd.f32 %v4153_v37, %v6256_v7  ;;  %v3022_v59 = vpop.f32.mrb[145].mxu0 }
 0x759   :  { %v3156_v63 = vadd.f32 %v6256_v7, %v3022_v59 }
 0x75a   :  { %v3189_v44 = vmax.f32 %v3157_v46, 0.0 }
 0x75b   :  { %v3188_v47 = vmax.f32 %v3156_v63, 0.0 }
 0x75d   :  { %v4402_v3 = vpack.c.bf16 %v3189_v44, %v3188_v47 }
 0x75f   :  { %v4156_v18 = vpop.f32.mrb[146].mxu0  ;;  %4403 = vmatprep.subr.bf16.mxu1 %v4402_v3 }
 0x760   :  { %v3159_v15 = vadd.f32 %v4156_v18, %v6256_v7  ;;  %v3032_v29 = vpop.f32.mrb[147].mxu0  ;;  %4405 = vmatpush3.bf16.msra.mxu1 %v4404_v10  ;;  %v3603_v18 = vld [vmem:[%s6365_s12] ss:$0 sm:$0xff] }
 0x761   :  { %v3158_v20 = vadd.f32 %v6256_v7, %v3032_v29 }
 0x762   :  { %v3191_v21 = vmax.f32 %v3159_v15, 0.0 }
 0x763   :  { %v3190_v8 = vmax.f32 %v3158_v20, 0.0 }
 0x765   :  { %v4406_v48 = vpack.c.bf16 %v3191_v21, %v3190_v8 }
 0x767   :  { %v4159_v26 = vpop.f32.mrb[148].mxu0  ;;  %4407 = vmatprep.subr.bf16.mxu1 %v4406_v48 }
 0x768   :  { %v3161_v0 = vadd.f32 %v4159_v26, %v6256_v7  ;;  %v3042_v57 = vpop.f32.mrb[149].mxu0  ;;  %4409 = vmatpush3.bf16.msra.mxu1 %v4408_v45 }
 0x769   :  { %v3160_v30 = vadd.f32 %v6256_v7, %v3042_v57 }
 0x76a   :  { %v3193_v32 = vmax.f32 %v3161_v0, 0.0 }
 0x76b   :  { %v3192_v54 = vmax.f32 %v3160_v30, 0.0 }
 0x76d   :  { %v4410_v55 = vpack.c.bf16 %v3193_v32, %v3192_v54 }
 0x76f   :  { %v4162_v22 = vpop.f32.mrb[150].mxu0  ;;  %4411 = vmatprep.subr.bf16.mxu1 %v4410_v55 }
 0x770   :  { %v3163_v10 = vadd.f32 %v4162_v22, %v6256_v7  ;;  %v3052_v62 = vpop.f32.mrb[151].mxu0  ;;  %4413 = vmatpush3.bf16.msra.mxu1 %v6267_v13 }
 0x771   :  { %v3162_v4 = vadd.f32 %v6256_v7, %v3052_v62 }
 0x772   :  { %v3195_v34 = vmax.f32 %v3163_v10, 0.0 }
 0x773   :  { %v3194_v6 = vmax.f32 %v3162_v4, 0.0 }
 0x775   :  { %v4414_v61 = vpack.c.bf16 %v3195_v34, %v3194_v6 }
 0x777   :  { %v4165_v12 = vpop.f32.mrb[152].mxu0  ;;  %4415 = vmatprep.subr.bf16.mxu1 %v4414_v61 }
 0x778   :  { %v3165_v45 = vadd.f32 %v4165_v12, %v6256_v7  ;;  %v3062_v2 = vpop.f32.mrb[153].mxu0  ;;  %4417 = vmatpush3.bf16.msra.mxu1 %v6271_v23 }
 0x779   :  { %v3164_v5 = vadd.f32 %v6256_v7, %v3062_v2 }
 0x77a   :  { %v3197_v11 = vmax.f32 %v3165_v45, 0.0 }
 0x77b   :  { %v3196_v27 = vmax.f32 %v3164_v5, 0.0 }
 0x77d   :  { %v4418_v35 = vpack.c.bf16 %v3197_v11, %v3196_v27 }
 0x77f   :  { %v4168_v38 = vpop.f32.mrb[154].mxu0  ;;  %4419 = vmatprep.subr.bf16.mxu1 %v4418_v35 }
 0x780   :  { %v3167_v13 = vadd.f32 %v4168_v38, %v6256_v7  ;;  %v3072_v17 = vpop.f32.mrb[155].mxu0  ;;  %4421 = vmatpush3.bf16.msra.mxu1 %v6275_v1 }
 0x781   :  { %v3166_v28 = vadd.f32 %v6256_v7, %v3072_v17 }
 0x782   :  { %v3199_v51 = vmax.f32 %v3167_v13, 0.0 }
 0x783   :  { %v3198_v33 = vmax.f32 %v3166_v28, 0.0 }
 0x785   :  { %v4422_v14 = vpack.c.bf16 %v3199_v51, %v3198_v33 }
 0x787   :  { %v4171_v24 = vpop.f32.mrb[156].mxu0  ;;  %4423 = vmatprep.subr.bf16.mxu1 %v4422_v14 }
 0x788   :  { %v3169_v23 = vadd.f32 %v4171_v24, %v6256_v7  ;;  %v3082_v41 = vpop.f32.mrb[157].mxu0  ;;  %4425 = vmatpush3.bf16.msra.mxu1 %v6279_v43  ;;  %v3284_v43 = vld [vmem:[%s6364_s11 + $0x8] sm:$0xff] }
 0x789   :  { %v3168_v31 = vadd.f32 %v6256_v7, %v3082_v41  ;;  %v4434_v56 = vpack.c.bf16 %v3284_v43, %v3283_v39 }
 0x78a   :  { %v3201_v60 = vmax.f32 %v3169_v23, 0.0 }
 0x78b   :  { %v3200_v16 = vmax.f32 %v3168_v31, 0.0 }
 0x78d   :  { %v4426_v50 = vpack.c.bf16 %v3201_v60, %v3200_v16 }
 0x78f   :  { %v4174_v58 = vpop.f32.mrb[158].mxu0  ;;  %4427 = vmatprep.subr.bf16.mxu1 %v4426_v50 }
 0x790   :  { %v3171_v1 = vadd.f32 %v4174_v58, %v6256_v7  ;;  %v3092_v49 = vpop.f32.mrb[159].mxu0  ;;  %4429 = vmatpush3.bf16.msra.mxu1 %v6283_v42  ;;  %v3204_v42 = vld [vmem:[%s6355_s2] sm:$0xff] }
 0x791   :  { %v3170_v19 = vadd.f32 %v6256_v7, %v3092_v49  ;;  %v3207_v7 = vld [vmem:[%s6355_s2 + $0x18] sm:$0xff] }
 0x792   :  { %v3203_v53 = vmax.f32 %v3171_v1, 0.0 }
 0x793   :  { %v3202_v40 = vmax.f32 %v3170_v19, 0.0 }
 0x795   :  { %v4430_v36 = vpack.c.bf16 %v3203_v53, %v3202_v40 }
 0x797   :  { %4431 = vmatprep.subr.bf16.mxu1 %v4430_v36 }
 0x798   :  { %4433 = vmatpush3.bf16.msra.mxu1 %v6287_v9  ;;  %v3286_v9 = vld [vmem:[%s6364_s11 + $0x18] sm:$0xff]  ;;  %s4697_s11 = smov [#allocation5]  }
 0x799   :  { %4435 = vmatprep.subr.bf16.mxu1 %v4434_v56  ;;  %v4438_v37 = vpack.c.bf16 %v3286_v9, %v3285_v25  ;;  %s3397_s12 = sshll.u32 %s4697_s11, 4  ;;  %s3398_s12 = int_to_ptr.vmem [resolvable:$true] %s3397_s12 }
 0x79a   :  { %s4667_s7 = scalar_lea.vmem %s3398_s12, 256  ;;  %p4672_p9 = scmp.lt.s32.totalorder %s3398_s12, %s3398_s12 }
 0x79b   :  { %3273 = vmatmul.mubr.f32.vlgmr.msra.gmra.mrb[160].mxu1 %v3204_v42  ;;  %p4668_p8 = scmp.ne.s32.totalorder %s3398_s12, %s4667_s7  ;;  %p4673_p10 = scmp.lt.s32.totalorder %s4667_s7, %s4667_s7 }
 0x79c   :  { %3277 = vmatprep.mubr.f32.mxu1 %v3207_v7  ;;  %4437 = vmatpush3.bf16.msra.mxu1 %v4434_v56 }
 0x79d   :  { %4439 = vmatprep.subr.bf16.mxu1 %v4438_v37  ;;  %p4674_p11 = por %p4673_p10, %p4672_p9 }
 0x79f   :  { %3278 = vmatmul.mubr.f32.gmra.mrb[162].mxu1 %v3206_v52  ;;  %p4675_p12 = pnand %p4674_p11, %p4668_p8 }
 0x7a0   :  { %4441 = vmatpush3.bf16.msra.mxu1 %v4438_v37 }
 0x86e   :  { %v3845_v46 = vpop.f32.mrb[160].mxu1 }
 0x86f   :  { %v3846_v59 = vpop.f32.mrb[161].mxu1 }
 0x870   :  { %v3847_v63 = vadd.f32 %v3846_v59, %v3845_v46 }
 0x872   :  { %v3848_v44 = vpop.f32.mrb[162].mxu1  ;;  %4183 = vmatprep.mubr.msk.f32.mxu1 %vm1908_vm1, %v3847_v63 }
 0x873   :  { %v3849_v47 = vpop.f32.mrb[163].mxu1 }
 0x874   :  { %v3850_v3 = vadd.f32 %v3849_v47, %v3848_v44 }
 0x876   :  { %4184 = vmatmul.mubr.msk.f32.vlgmr.msra.gmra.mrb[164].mxu1 %vm1908_vm1, %v3850_v3 }
 0x949   :  { %v4185_v15 = vpop.f32.mrb[164].mxu1 }
 0x94a   :  { %v3366_v29 = vpop.f32.mrb[165].mxu1  ;;  %v3372_v20 = vadd.f32 %v4185_v15, %v3603_v18 }
 0x94b   :  { %v3367_v21 = vadd.f32 %v3603_v18, %v3366_v29 }
 0x94c   :  { %v3376_v26 = vmul.f32 %v3372_v20, %v3372_v20 }
 0x94d   :  { %v3375_v8 = vmul.f32 %v3367_v21, %v3367_v21 }
 0x94e   :  { %v3381_v0 = vsel %vm3377_vm2, %v3376_v26, 0.0 }
 0x94f   :  { %v3378_v48 = vsel %vm3377_vm2, %v3375_v8, 0.0 }
 0x950   :  { %3379 = vadd.xlane.f32.xlu0 %v3378_v48 }
 0x954   :  { %3382 = vadd.xlane.f32.xlu0 %v3381_v0 }
 0x9dd   :  { %v3380_v57 = vpop.xlane.xlu0 %3379 }
 0x9de   :  { %v3384_v30 = vmax.f32 %v3380_v57, 1e-24 }
 0x9e0   :  { %4577 = vrsqrt.f32 %v3384_v30 }
 0x9e1   :  { %v3383_v32 = vpop.xlane.xlu0 %3382 }
 0x9e2   :  { %v3385_v54 = vmax.f32 %v3383_v32, 1e-24 }
 0x9e4   :  { %4579 = vrsqrt.f32 %v3385_v54 }
 0x9ea   :  { %v4578_v55 = vpop.eup %4577 }
 0x9eb   :  { %v3388_v22 = vmul.f32 %v4578_v55, %v3367_v21 }
 0x9ed   :  { %3390 = vst.msk [vmem:[#allocation5] sm:$0xff] %vm3377_vm2, %v3388_v22 }
 0x9ee   :  { %v4580_v10 = vpop.eup %4579 }
 0x9ef   :  { %v3389_v62 = vmul.f32 %v4580_v10, %v3372_v20 }
 0x9f1   :  { %3391 = vst.msk [vmem:[#allocation5 + $0x8] sm:$0xff] %vm3377_vm2, %v3389_v62 }
 0x9f2   :  { %4678 = shalt.err (!%p4675_p12)
}
 0x9f3   :  { %s4679_s4 = scalar_lea.hbm %s6366_s13, 256 }
 0x9f4   :  { %p4680_p13 = scmp.ne.s32.totalorder %s6366_s13, %s4679_s4  ;;  %p4683_p0 = scmp.lt.u32.totalorder %s4679_s4, %s6366_s13 }
 0x9f6   :  { %p4685_p1 = pnand %p4683_p0, %p4680_p13 }
 0x9f8   :  { %4688 = shalt.err (!%p4685_p1)
}
 0x9f9   :  { %s4698_s9 = smov 128   ;;  %s4699_s17 = smov 8  }
 0x9fa   :  { %3403 = dma.vmem_to_hbm [thread:$0]  %s3398_s12, 256, %s6366_s13, [#allocation4], %s4698_s9, %s4698_s9, %s4699_s17  }
 0x9fb   :  { %4691 = dma.done.wait [#allocation4], 256  }
 0x9fc   :  { %4692 = vsyncadd [#allocation4], 4294967040 }
 0x9fd   :  { %3407 = vsyncpa [#allocation3], 1 }
 0x9fe   :  { %3408 = vsyncpa [#allocation4], 1 }

</bundles_post_ra>
